<compile_context>
chip_gen: v7x
topology: tpu7x:2x2x1
jax: 0.10.0
libtpu: 0.0.40
codegen_flags: <defaults>
</compile_context>

<pallas_src>
import functools

import jax
import jax.numpy as jnp
from jax.experimental import pallas as pl
from jax.experimental.pallas import tpu as pltpu


# ---------------------------------------------------------------------------
# In-kernel helpers
# ---------------------------------------------------------------------------
def _ln_f32(x, gamma, beta, eps):
    """LayerNorm over the last dim; x f32, gamma/beta (1, N) f32."""
    mu = jnp.mean(x, axis=-1, keepdims=True)
    var = jnp.mean(jnp.square(x - mu), axis=-1, keepdims=True)
    return (x - mu) * jax.lax.rsqrt(var + eps) * gamma + beta


# ---------------------------------------------------------------------------
# Fused kernel: [emb-LN] -> L x encoder layer -> [CLS pooler + classifier]
# ---------------------------------------------------------------------------
def _bert_fused_kernel(
    # constant inputs (fetched once; index_map constant across the layer grid axis)
    emb_ref, mask_ref, emb_g_ref, emb_b_ref,
    # per-layer stacked weights (leading layer axis squeezed away)
    qkv_w_ref, qkv_b_ref,
    ao_w_ref, ao_b_ref, aln_g_ref, aln_b_ref,
    fi_w_ref, fi_b_ref, fo_w_ref, fo_b_ref, fln_g_ref, fln_b_ref,
    # head (pooler + classifier), used only on the last grid step
    pool_w_ref, pool_b_ref, fc_w_ref, fc_b_ref,
    # output
    logits_ref,
    # scratch (persists across grid steps)
    x_scr,      # (B*S, H)  bf16 activations, resident across layers
    qkv_scr,    # (B*S, 3H) bf16 staged QKV (ref slicing instead of vreg lane-selects)
    *, B, S, nH, dh, eps,
):
    H = nH * dh
    layer = pl.program_id(0)

    # ---- step 0: embedding LayerNorm (fused; no standalone pallas_call) -----------------
    @pl.when(layer == 0)
    def _():
        e = emb_ref[...].astype(jnp.float32)
        x_scr[...] = _ln_f32(e, emb_g_ref[...], emb_b_ref[...], eps).astype(x_scr.dtype)

    # ---- fused QKV projection: one MXU pass, N = 3H; stage into VMEM scratch ------------
    x_bf = x_scr[...]                                                   # (B*S, H) bf16
    qkv = jnp.dot(x_bf, qkv_w_ref[...],
                  preferred_element_type=jnp.float32) + qkv_b_ref[...]  # (B*S, 3H) f32
    qkv_scr[...] = qkv.astype(qkv_scr.dtype)                            # single bf16 store

    # ---- multi-head self-attention; context kept in registers (bf16) --------------------
    # 1/sqrt(dh) is pre-folded into the Q columns of qkv_w/qkv_b (init time).
    # q/k/v are read as static slices of the scratch ref (addressing, not vreg selects).
    batch_ctx = []
    for b in range(B):
        r0 = b * S
        bias_b = mask_ref[b:b + 1, :]                      # (1, S) additive key-mask bias
        head_ctx = []
        for h in range(nH):
            q = qkv_scr[r0:r0 + S, h * dh:(h + 1) * dh]
            k = qkv_scr[r0:r0 + S, H + h * dh:H + (h + 1) * dh]
            v = qkv_scr[r0:r0 + S, 2 * H + h * dh:2 * H + (h + 1) * dh]
            # s = q @ k^T (NT matmul, contraction over dh), f32 accumulation.
            s = jax.lax.dot_general(q, k, (((1,), (1,)), ((), ())),
                                    preferred_element_type=jnp.float32)
            s = s + bias_b
            s = s - jnp.max(s, axis=-1, keepdims=True)
            p = jnp.exp(s)
            p = p * pl.reciprocal(jnp.sum(p, axis=-1, keepdims=True), approx=True)
            ctx_h = jnp.dot(p.astype(v.dtype), v, preferred_element_type=jnp.float32)
            head_ctx.append(ctx_h.astype(jnp.bfloat16))    # (S, dh) bf16
        batch_ctx.append(jnp.concatenate(head_ctx, axis=-1))   # (S, H) bf16
    ctx = jnp.concatenate(batch_ctx, axis=0)                    # (B*S, H) bf16, no scratch

    # ---- attention output projection + residual + LayerNorm -----------------------------
    attn = jnp.dot(ctx, ao_w_ref[...],
                   preferred_element_type=jnp.float32) + ao_b_ref[...]
    x_res = x_scr[...].astype(jnp.float32)                 # re-read -> short live range
    x1 = _ln_f32(attn + x_res, aln_g_ref[...], aln_b_ref[...], eps)

    # ---- FFN (GELU) + residual + LayerNorm -----------------------------------------------
    h_mid = jnp.dot(x1.astype(jnp.bfloat16), fi_w_ref[...],
                    preferred_element_type=jnp.float32) + fi_b_ref[...]
    # TODO(synk): HF bert-base uses exact erf GELU; tanh-approx kept (EUP-friendly,
    #             known-good Mosaic lowering). Swap to approximate=False for bit parity.
    h_mid = jax.nn.gelu(h_mid, approximate=True)
    ffn = jnp.dot(h_mid.astype(jnp.bfloat16), fo_w_ref[...],
                  preferred_element_type=jnp.float32) + fo_b_ref[...]
    x2 = _ln_f32(ffn + x1, fln_g_ref[...], fln_b_ref[...], eps)
    x_scr[...] = x2.astype(x_scr.dtype)                    # resident for next layer

    # ---- last step: [CLS] -> pooler(tanh) -> classifier; only logits leave the kernel ---
    @pl.when(layer == pl.num_programs(0) - 1)
    def _():
        cls = jnp.concatenate([x2[b * S:b * S + 1, :] for b in range(B)], axis=0)  # (B, H)
        pooled = jnp.tanh(jnp.dot(cls, pool_w_ref[...],
                                  preferred_element_type=jnp.float32) + pool_b_ref[...])
        # nn.Dropout(p=0.3) is identity at inference time.
        logits = jnp.dot(pooled, fc_w_ref[...],
                         preferred_element_type=jnp.float32) + fc_b_ref[...]
        logits_ref[...] = logits.astype(logits_ref.dtype)


# ---------------------------------------------------------------------------
# Synthetic "BERT" config + deterministic parameter init
# ---------------------------------------------------------------------------
class Config:
    vocab_size = 100
    hidden = 32
    heads = 4
    layers = 2
    intermediate = 64
    max_pos = 16
    type_vocab = 2
    n_classes = 3
    seq = 8
    batch = 2


def init_params(key, cfg):
    def init(k, shape):
        return 0.02 * jax.random.normal(k, shape, jnp.float32)

    keys = iter(jax.random.split(key, 256))
    H, I = cfg.hidden, cfg.intermediate
    dh = H // cfg.heads
    scale = 1.0 / float(dh) ** 0.5

    p = {}
    p["word_emb"] = init(next(keys), (cfg.vocab_size, H))
    p["pos_emb"] = init(next(keys), (cfg.max_pos, H))
    p["type_emb"] = init(next(keys), (cfg.type_vocab, H))
    p["emb_ln_g"] = jnp.ones((1, H), jnp.float32)
    p["emb_ln_b"] = jnp.zeros((1, H), jnp.float32)

    qkv_w, qkv_b = [], []
    ao_w, ao_b, aln_g, aln_b = [], [], [], []
    fi_w, fi_b, fo_w, fo_b, fln_g, fln_b = [], [], [], [], [], []
    for _ in range(cfg.layers):
        # Fold the 1/sqrt(dh) attention scale into the Q weight/bias columns (one-time prep).
        wq = init(next(keys), (H, H)) * scale
        wk = init(next(keys), (H, H))
        wv = init(next(keys), (H, H))
        qkv_w.append(jnp.concatenate([wq, wk, wv], axis=1))                  # (H, 3H)
        bq = jnp.zeros((H,), jnp.float32) * scale
        qkv_b.append(jnp.concatenate(
            [bq, jnp.zeros((H,), jnp.float32), jnp.zeros((H,), jnp.float32)])[None, :])
        ao_w.append(init(next(keys), (H, H)))
        ao_b.append(jnp.zeros((1, H), jnp.float32))
        aln_g.append(jnp.ones((1, H), jnp.float32))
        aln_b.append(jnp.zeros((1, H), jnp.float32))
        fi_w.append(init(next(keys), (H, I)))
        fi_b.append(jnp.zeros((1, I), jnp.float32))
        fo_w.append(init(next(keys), (I, H)))
        fo_b.append(jnp.zeros((1, H), jnp.float32))
        fln_g.append(jnp.ones((1, H), jnp.float32))
        fln_b.append(jnp.zeros((1, H), jnp.float32))

    # Stack per-layer weights on a leading axis; bf16 storage for MXU operands,
    # biases / LayerNorm params stay f32.
    p["enc"] = {
        "qkv_w": jnp.stack(qkv_w).astype(jnp.bfloat16),   # (L, H, 3H)
        "qkv_b": jnp.stack(qkv_b),                        # (L, 1, 3H)
        "ao_w": jnp.stack(ao_w).astype(jnp.bfloat16),     # (L, H, H)
        "ao_b": jnp.stack(ao_b),
        "aln_g": jnp.stack(aln_g),
        "aln_b": jnp.stack(aln_b),
        "fi_w": jnp.stack(fi_w).astype(jnp.bfloat16),     # (L, H, I)
        "fi_b": jnp.stack(fi_b),
        "fo_w": jnp.stack(fo_w).astype(jnp.bfloat16),     # (L, I, H)
        "fo_b": jnp.stack(fo_b),
        "fln_g": jnp.stack(fln_g),
        "fln_b": jnp.stack(fln_b),
    }
    p["pool_w"] = init(next(keys), (H, H))
    p["pool_b"] = jnp.zeros((1, H), jnp.float32)
    p["fc_w"] = init(next(keys), (H, cfg.n_classes))
    p["fc_b"] = jnp.zeros((1, cfg.n_classes), jnp.float32)
    return p


# ---------------------------------------------------------------------------
# Forward pass (mirrors BERTClassifier.forward)
# ---------------------------------------------------------------------------
def bert_classifier_forward(params, input_ids, attention_mask, *, cfg):
    B, S = input_ids.shape
    H = cfg.hidden

    # Embedding table gathers + tiny adds are XLA glue (no clean Pallas win for a gather
    # at this size); everything downstream is one fused Pallas kernel.
    tok = jnp.take(params["word_emb"], input_ids, axis=0)              # (B,S,H)
    pos = params["pos_emb"][:S][None, :, :]                            # (1,S,H)
    typ = params["type_emb"][0][None, None, :]                         # token_type_ids = 0
    emb = (tok + pos + typ).reshape(B * S, H).astype(jnp.float32)

    # Compact (B, S) additive attention-mask bias; broadcast over queries inside the kernel.
    mask_bias = (1.0 - attention_mask.astype(jnp.float32)) * -10000.0  # (B, S)

    enc = params["enc"]
    kern = functools.partial(
        _bert_fused_kernel, B=B, S=S, nH=cfg.heads, dh=H // cfg.heads, eps=1e-12)

    def const_spec(a):      # full array, fetched once (constant block index)
        return pl.BlockSpec(a.shape, lambda i: (0, 0))

    def layer_spec(a):      # leading layer axis streamed per grid step, squeezed in-kernel
        return pl.BlockSpec((None,) + a.shape[1:], lambda i: (i, 0, 0))

    in_arrays = (
        emb, mask_bias, params["emb_ln_g"], params["emb_ln_b"],
        enc["qkv_w"], enc["qkv_b"],
        enc["ao_w"], enc["ao_b"], enc["aln_g"], enc["aln_b"],
        enc["fi_w"], enc["fi_b"], enc["fo_w"], enc["fo_b"], enc["fln_g"], enc["fln_b"],
        params["pool_w"], params["pool_b"], params["fc_w"], params["fc_b"],
    )
    in_specs = [
        const_spec(emb), const_spec(mask_bias),
        const_spec(params["emb_ln_g"]), const_spec(params["emb_ln_b"]),
        layer_spec(enc["qkv_w"]), layer_spec(enc["qkv_b"]),
        layer_spec(enc["ao_w"]), layer_spec(enc["ao_b"]),
        layer_spec(enc["aln_g"]), layer_spec(enc["aln_b"]),
        layer_spec(enc["fi_w"]), layer_spec(enc["fi_b"]),
        layer_spec(enc["fo_w"]), layer_spec(enc["fo_b"]),
        layer_spec(enc["fln_g"]), layer_spec(enc["fln_b"]),
        const_spec(params["pool_w"]), const_spec(params["pool_b"]),
        const_spec(params["fc_w"]), const_spec(params["fc_b"]),
    ]

    logits = pl.pallas_call(
        kern,
        out_shape=jax.ShapeDtypeStruct((B, cfg.n_classes), jnp.float32),
        grid=(cfg.layers,),
        in_specs=in_specs,
        out_specs=pl.BlockSpec((B, cfg.n_classes), lambda i: (0, 0)),
        scratch_shapes=[
            pltpu.VMEM((B * S, H), jnp.bfloat16),        # resident activations x
            pltpu.VMEM((B * S, 3 * H), jnp.bfloat16),    # staged QKV
        ],
        compiler_params=pltpu.CompilerParams(dimension_semantics=("arbitrary",)),
    )(*in_arrays)
    return logits


if __name__ == "__main__":
    cfg = Config()
    key = jax.random.PRNGKey(0)
    kp, ki = jax.random.split(key)
    params = init_params(kp, cfg)

    input_ids = jax.random.randint(
        ki, (cfg.batch, cfg.seq), 0, cfg.vocab_size, dtype=jnp.int32
    )
    attention_mask = jnp.array(
        [[1, 1, 1, 1, 1, 1, 1, 1],
         [1, 1, 1, 1, 1, 1, 0, 0]], dtype=jnp.int32
    )

    fwd = jax.jit(functools.partial(bert_classifier_forward, cfg=cfg))
    logits = fwd(params, input_ids, attention_mask)
    jax.block_until_ready(logits)

    assert logits.shape == (cfg.batch, cfg.n_classes)
    assert bool(jnp.all(jnp.isfinite(logits)))
    print("KERNEL_OK")
</pallas_src>

<mosaic_0001>
module attributes {stable_mosaic.version = 11 : i64} {
  func.func @_bert_fused_kernel(%arg0: i32, %arg1: memref<16x32xf32, #tpu.memory_space<vmem>>, %arg2: memref<2x8xf32, #tpu.memory_space<vmem>>, %arg3: memref<1x32xf32, #tpu.memory_space<vmem>>, %arg4: memref<1x32xf32, #tpu.memory_space<vmem>>, %arg5: memref<1x32x96xbf16, #tpu.memory_space<vmem>>, %arg6: memref<1x1x96xf32, #tpu.memory_space<vmem>>, %arg7: memref<1x32x32xbf16, #tpu.memory_space<vmem>>, %arg8: memref<1x1x32xf32, #tpu.memory_space<vmem>>, %arg9: memref<1x1x32xf32, #tpu.memory_space<vmem>>, %arg10: memref<1x1x32xf32, #tpu.memory_space<vmem>>, %arg11: memref<1x32x64xbf16, #tpu.memory_space<vmem>>, %arg12: memref<1x1x64xf32, #tpu.memory_space<vmem>>, %arg13: memref<1x64x32xbf16, #tpu.memory_space<vmem>>, %arg14: memref<1x1x32xf32, #tpu.memory_space<vmem>>, %arg15: memref<1x1x32xf32, #tpu.memory_space<vmem>>, %arg16: memref<1x1x32xf32, #tpu.memory_space<vmem>>, %arg17: memref<32x32xf32, #tpu.memory_space<vmem>>, %arg18: memref<1x32xf32, #tpu.memory_space<vmem>>, %arg19: memref<32x3xf32, #tpu.memory_space<vmem>>, %arg20: memref<1x3xf32, #tpu.memory_space<vmem>>, %arg21: memref<2x3xf32, #tpu.memory_space<vmem>>, %arg22: memref<16x32xbf16, #tpu.memory_space<vmem>>, %arg23: memref<16x96xbf16, #tpu.memory_space<vmem>>) attributes {dimension_semantics = [#tpu.dimension_semantics<arbitrary>], iteration_bounds = array<i64: 2>, scalar_prefetch = 0 : i64, scratch_operands = 2 : i64, tpu.core_type = #tpu.core_type<tc>, window_params = [{pipeline_mode = #tpu.pipeline_mode<synchronous>, transform_indices = @transform_0, window_bounds = array<i64: 16, 32>}, {pipeline_mode = #tpu.pipeline_mode<synchronous>, transform_indices = @transform_1, window_bounds = array<i64: 2, 8>}, {pipeline_mode = #tpu.pipeline_mode<synchronous>, transform_indices = @transform_2, window_bounds = array<i64: 1, 32>}, {pipeline_mode = #tpu.pipeline_mode<synchronous>, transform_indices = @transform_3, window_bounds = array<i64: 1, 32>}, {transform_indices = @transform_4, window_bounds = array<i64: 1, 32, 96>}, {transform_indices = @transform_5, window_bounds = array<i64: 1, 1, 96>}, {transform_indices = @transform_6, window_bounds = array<i64: 1, 32, 32>}, {transform_indices = @transform_7, window_bounds = array<i64: 1, 1, 32>}, {transform_indices = @transform_8, window_bounds = array<i64: 1, 1, 32>}, {transform_indices = @transform_9, window_bounds = array<i64: 1, 1, 32>}, {transform_indices = @transform_10, window_bounds = array<i64: 1, 32, 64>}, {transform_indices = @transform_11, window_bounds = array<i64: 1, 1, 64>}, {transform_indices = @transform_12, window_bounds = array<i64: 1, 64, 32>}, {transform_indices = @transform_13, window_bounds = array<i64: 1, 1, 32>}, {transform_indices = @transform_14, window_bounds = array<i64: 1, 1, 32>}, {transform_indices = @transform_15, window_bounds = array<i64: 1, 1, 32>}, {pipeline_mode = #tpu.pipeline_mode<synchronous>, transform_indices = @transform_16, window_bounds = array<i64: 32, 32>}, {pipeline_mode = #tpu.pipeline_mode<synchronous>, transform_indices = @transform_17, window_bounds = array<i64: 1, 32>}, {pipeline_mode = #tpu.pipeline_mode<synchronous>, transform_indices = @transform_18, window_bounds = array<i64: 32, 3>}, {pipeline_mode = #tpu.pipeline_mode<synchronous>, transform_indices = @transform_19, window_bounds = array<i64: 1, 3>}, {pipeline_mode = #tpu.pipeline_mode<synchronous>, transform_indices = @transform_20, window_bounds = array<i64: 2, 3>}]} {
    %c0_i32 = arith.constant 0 : i32
    %0 = arith.cmpi eq, %arg0, %c0_i32 : i32
    %1 = arith.extui %0 : i1 to i32
    %c0_i32_0 = arith.constant 0 : i32
    %2 = arith.cmpi ne, %1, %c0_i32_0 : i32
    scf.if %2 {
      %c0_134 = arith.constant 0 : index
      %c0_135 = arith.constant 0 : index
      %267 = vector.load %arg1[%c0_134, %c0_135] : memref<16x32xf32, #tpu.memory_space<vmem>>, vector<16x32xf32>
      %c0_136 = arith.constant 0 : index
      %c0_137 = arith.constant 0 : index
      %268 = vector.load %arg3[%c0_136, %c0_137] : memref<1x32xf32, #tpu.memory_space<vmem>>, vector<1x32xf32>
      %c0_138 = arith.constant 0 : index
      %c0_139 = arith.constant 0 : index
      %269 = vector.load %arg4[%c0_138, %c0_139] : memref<1x32xf32, #tpu.memory_space<vmem>>, vector<1x32xf32>
      %cst_140 = arith.constant dense<0.000000e+00> : vector<16xf32>
      %270 = vector.multi_reduction <add>, %267, %cst_140 [1] : vector<16x32xf32> to vector<16xf32>
      %271 = vector.shape_cast %270 : vector<16xf32> to vector<16x1xf32>
      %cst_141 = arith.constant 3.200000e+01 : f32
      %272 = vector.broadcast %cst_141 : f32 to vector<16x1xf32>
      %273 = arith.divf %271, %272 : vector<16x1xf32>
      %274 = vector.broadcast %273 : vector<16x1xf32> to vector<16x32xf32>
      %275 = arith.subf %267, %274 : vector<16x32xf32>
      %276 = arith.mulf %275, %275 : vector<16x32xf32>
      %cst_142 = arith.constant dense<0.000000e+00> : vector<16xf32>
      %277 = vector.multi_reduction <add>, %276, %cst_142 [1] : vector<16x32xf32> to vector<16xf32>
      %278 = vector.shape_cast %277 : vector<16xf32> to vector<16x1xf32>
      %cst_143 = arith.constant 3.200000e+01 : f32
      %279 = vector.broadcast %cst_143 : f32 to vector<16x1xf32>
      %280 = arith.divf %278, %279 : vector<16x1xf32>
      %281 = vector.broadcast %273 : vector<16x1xf32> to vector<16x32xf32>
      %282 = arith.subf %267, %281 : vector<16x32xf32>
      %cst_144 = arith.constant 9.99999996E-13 : f32
      %283 = vector.broadcast %cst_144 : f32 to vector<16x1xf32>
      %284 = arith.addf %280, %283 : vector<16x1xf32>
      %285 = math.rsqrt %284 : vector<16x1xf32>
      %286 = vector.broadcast %285 : vector<16x1xf32> to vector<16x32xf32>
      %287 = arith.mulf %282, %286 : vector<16x32xf32>
      %288 = vector.broadcast %268 : vector<1x32xf32> to vector<16x32xf32>
      %289 = arith.mulf %287, %288 : vector<16x32xf32>
      %290 = vector.broadcast %269 : vector<1x32xf32> to vector<16x32xf32>
      %291 = arith.addf %289, %290 : vector<16x32xf32>
      %292 = arith.truncf %291 : vector<16x32xf32> to vector<16x32xbf16>
      %c0_145 = arith.constant 0 : index
      %c0_146 = arith.constant 0 : index
      %293 = vector.load %arg22[%c0_145, %c0_146] : memref<16x32xbf16, #tpu.memory_space<vmem>>, vector<16x32xbf16>
      tpu.vector_store %arg22[%c0_145, %c0_146], %292 {strides = array<i32>} : memref<16x32xbf16, #tpu.memory_space<vmem>>, vector<16x32xbf16>,
    } else {
    }
    %c0 = arith.constant 0 : index
    %c0_1 = arith.constant 0 : index
    %3 = vector.load %arg22[%c0, %c0_1] : memref<16x32xbf16, #tpu.memory_space<vmem>>, vector<16x32xbf16>
    %c0_2 = arith.constant 0 : index
    %c0_3 = arith.constant 0 : index
    %c0_4 = arith.constant 0 : index
    %4 = vector.load %arg5[%c0_2, %c0_3, %c0_4] : memref<1x32x96xbf16, #tpu.memory_space<vmem>>, vector<1x32x96xbf16>
    %5 = vector.shape_cast %4 : vector<1x32x96xbf16> to vector<32x96xbf16>
    %cst = arith.constant dense<0.000000e+00> : vector<16x96xf32>
    %6 = tpu.matmul %3, %5, %cst {dimension_numbers = #tpu.dot_dimension_numbers<[1], [0], [0], [1], [0, 0, 1, 1], [], []>} : vector<16x32xbf16>, vector<32x96xbf16>, vector<16x96xf32> -> vector<16x96xf32>
    %c0_5 = arith.constant 0 : index
    %c0_6 = arith.constant 0 : index
    %c0_7 = arith.constant 0 : index
    %7 = vector.load %arg6[%c0_5, %c0_6, %c0_7] : memref<1x1x96xf32, #tpu.memory_space<vmem>>, vector<1x1x96xf32>
    %8 = vector.shape_cast %7 : vector<1x1x96xf32> to vector<1x96xf32>
    %9 = vector.broadcast %8 : vector<1x96xf32> to vector<16x96xf32>
    %10 = arith.addf %6, %9 : vector<16x96xf32>
    %11 = arith.truncf %10 : vector<16x96xf32> to vector<16x96xbf16>
    %c0_8 = arith.constant 0 : index
    %c0_9 = arith.constant 0 : index
    %12 = vector.load %arg23[%c0_8, %c0_9] : memref<16x96xbf16, #tpu.memory_space<vmem>>, vector<16x96xbf16>
    tpu.vector_store %arg23[%c0_8, %c0_9], %11 {strides = array<i32>} : memref<16x96xbf16, #tpu.memory_space<vmem>>, vector<16x96xbf16>,
    %c0_10 = arith.constant 0 : index
    %c0_11 = arith.constant 0 : index
    %13 = vector.load %arg2[%c0_10, %c0_11] : memref<2x8xf32, #tpu.memory_space<vmem>>, vector<1x8xf32>
    %c0_12 = arith.constant 0 : index
    %c0_13 = arith.constant 0 : index
    %14 = vector.load %arg23[%c0_12, %c0_13] : memref<16x96xbf16, #tpu.memory_space<vmem>>, vector<8x8xbf16>
    %c0_14 = arith.constant 0 : index
    %c32 = arith.constant 32 : index
    %15 = vector.load %arg23[%c0_14, %c32] : memref<16x96xbf16, #tpu.memory_space<vmem>>, vector<8x8xbf16>
    %c0_15 = arith.constant 0 : index
    %c64 = arith.constant 64 : index
    %16 = vector.load %arg23[%c0_15, %c64] : memref<16x96xbf16, #tpu.memory_space<vmem>>, vector<8x8xbf16>
    %cst_16 = arith.constant dense<0.000000e+00> : vector<8x8xf32>
    %17 = tpu.matmul %14, %15, %cst_16 {dimension_numbers = #tpu.dot_dimension_numbers<[1], [1], [0], [0], [0, 0, 1, 0], [], []>} : vector<8x8xbf16>, vector<8x8xbf16>, vector<8x8xf32> -> vector<8x8xf32>
    %18 = vector.broadcast %13 : vector<1x8xf32> to vector<8x8xf32>
    %19 = arith.addf %17, %18 : vector<8x8xf32>
    %cst_17 = arith.constant dense<0xFF800000> : vector<8xf32>
    %20 = vector.multi_reduction <maximumf>, %19, %cst_17 [1] : vector<8x8xf32> to vector<8xf32>
    %21 = vector.shape_cast %20 : vector<8xf32> to vector<8x1xf32>
    %22 = vector.broadcast %21 : vector<8x1xf32> to vector<8x8xf32>
    %23 = arith.subf %19, %22 : vector<8x8xf32>
    %24 = math.exp %23 : vector<8x8xf32>
    %cst_18 = arith.constant dense<0.000000e+00> : vector<8xf32>
    %25 = vector.multi_reduction <add>, %24, %cst_18 [1] : vector<8x8xf32> to vector<8xf32>
    %26 = vector.shape_cast %25 : vector<8xf32> to vector<8x1xf32>
    %27 = tpu.reciprocal %26 {approx = true} : vector<8x1xf32> -> vector<8x1xf32>
    %28 = vector.broadcast %27 : vector<8x1xf32> to vector<8x8xf32>
    %29 = arith.mulf %24, %28 : vector<8x8xf32>
    %30 = arith.truncf %29 : vector<8x8xf32> to vector<8x8xbf16>
    %cst_19 = arith.constant dense<0.000000e+00> : vector<8x8xf32>
    %31 = tpu.matmul %30, %16, %cst_19 {dimension_numbers = #tpu.dot_dimension_numbers<[1], [0], [0], [1], [0, 0, 1, 1], [], []>} : vector<8x8xbf16>, vector<8x8xbf16>, vector<8x8xf32> -> vector<8x8xf32>
    %32 = arith.truncf %31 : vector<8x8xf32> to vector<8x8xbf16>
    %c0_20 = arith.constant 0 : index
    %c8 = arith.constant 8 : index
    %33 = vector.load %arg23[%c0_20, %c8] : memref<16x96xbf16, #tpu.memory_space<vmem>>, vector<8x8xbf16>
    %c0_21 = arith.constant 0 : index
    %c40 = arith.constant 40 : index
    %34 = vector.load %arg23[%c0_21, %c40] : memref<16x96xbf16, #tpu.memory_space<vmem>>, vector<8x8xbf16>
    %c0_22 = arith.constant 0 : index
    %c72 = arith.constant 72 : index
    %35 = vector.load %arg23[%c0_22, %c72] : memref<16x96xbf16, #tpu.memory_space<vmem>>, vector<8x8xbf16>
    %cst_23 = arith.constant dense<0.000000e+00> : vector<8x8xf32>
    %36 = tpu.matmul %33, %34, %cst_23 {dimension_numbers = #tpu.dot_dimension_numbers<[1], [1], [0], [0], [0, 0, 1, 0], [], []>} : vector<8x8xbf16>, vector<8x8xbf16>, vector<8x8xf32> -> vector<8x8xf32>
    %37 = vector.broadcast %13 : vector<1x8xf32> to vector<8x8xf32>
    %38 = arith.addf %36, %37 : vector<8x8xf32>
    %cst_24 = arith.constant dense<0xFF800000> : vector<8xf32>
    %39 = vector.multi_reduction <maximumf>, %38, %cst_24 [1] : vector<8x8xf32> to vector<8xf32>
    %40 = vector.shape_cast %39 : vector<8xf32> to vector<8x1xf32>
    %41 = vector.broadcast %40 : vector<8x1xf32> to vector<8x8xf32>
    %42 = arith.subf %38, %41 : vector<8x8xf32>
    %43 = math.exp %42 : vector<8x8xf32>
    %cst_25 = arith.constant dense<0.000000e+00> : vector<8xf32>
    %44 = vector.multi_reduction <add>, %43, %cst_25 [1] : vector<8x8xf32> to vector<8xf32>
    %45 = vector.shape_cast %44 : vector<8xf32> to vector<8x1xf32>
    %46 = tpu.reciprocal %45 {approx = true} : vector<8x1xf32> -> vector<8x1xf32>
    %47 = vector.broadcast %46 : vector<8x1xf32> to vector<8x8xf32>
    %48 = arith.mulf %43, %47 : vector<8x8xf32>
    %49 = arith.truncf %48 : vector<8x8xf32> to vector<8x8xbf16>
    %cst_26 = arith.constant dense<0.000000e+00> : vector<8x8xf32>
    %50 = tpu.matmul %49, %35, %cst_26 {dimension_numbers = #tpu.dot_dimension_numbers<[1], [0], [0], [1], [0, 0, 1, 1], [], []>} : vector<8x8xbf16>, vector<8x8xbf16>, vector<8x8xf32> -> vector<8x8xf32>
    %51 = arith.truncf %50 : vector<8x8xf32> to vector<8x8xbf16>
    %c0_27 = arith.constant 0 : index
    %c16 = arith.constant 16 : index
    %52 = vector.load %arg23[%c0_27, %c16] : memref<16x96xbf16, #tpu.memory_space<vmem>>, vector<8x8xbf16>
    %c0_28 = arith.constant 0 : index
    %c48 = arith.constant 48 : index
    %53 = vector.load %arg23[%c0_28, %c48] : memref<16x96xbf16, #tpu.memory_space<vmem>>, vector<8x8xbf16>
    %c0_29 = arith.constant 0 : index
    %c80 = arith.constant 80 : index
    %54 = vector.load %arg23[%c0_29, %c80] : memref<16x96xbf16, #tpu.memory_space<vmem>>, vector<8x8xbf16>
    %cst_30 = arith.constant dense<0.000000e+00> : vector<8x8xf32>
    %55 = tpu.matmul %52, %53, %cst_30 {dimension_numbers = #tpu.dot_dimension_numbers<[1], [1], [0], [0], [0, 0, 1, 0], [], []>} : vector<8x8xbf16>, vector<8x8xbf16>, vector<8x8xf32> -> vector<8x8xf32>
    %56 = vector.broadcast %13 : vector<1x8xf32> to vector<8x8xf32>
    %57 = arith.addf %55, %56 : vector<8x8xf32>
    %cst_31 = arith.constant dense<0xFF800000> : vector<8xf32>
    %58 = vector.multi_reduction <maximumf>, %57, %cst_31 [1] : vector<8x8xf32> to vector<8xf32>
    %59 = vector.shape_cast %58 : vector<8xf32> to vector<8x1xf32>
    %60 = vector.broadcast %59 : vector<8x1xf32> to vector<8x8xf32>
    %61 = arith.subf %57, %60 : vector<8x8xf32>
    %62 = math.exp %61 : vector<8x8xf32>
    %cst_32 = arith.constant dense<0.000000e+00> : vector<8xf32>
    %63 = vector.multi_reduction <add>, %62, %cst_32 [1] : vector<8x8xf32> to vector<8xf32>
    %64 = vector.shape_cast %63 : vector<8xf32> to vector<8x1xf32>
    %65 = tpu.reciprocal %64 {approx = true} : vector<8x1xf32> -> vector<8x1xf32>
    %66 = vector.broadcast %65 : vector<8x1xf32> to vector<8x8xf32>
    %67 = arith.mulf %62, %66 : vector<8x8xf32>
    %68 = arith.truncf %67 : vector<8x8xf32> to vector<8x8xbf16>
    %cst_33 = arith.constant dense<0.000000e+00> : vector<8x8xf32>
    %69 = tpu.matmul %68, %54, %cst_33 {dimension_numbers = #tpu.dot_dimension_numbers<[1], [0], [0], [1], [0, 0, 1, 1], [], []>} : vector<8x8xbf16>, vector<8x8xbf16>, vector<8x8xf32> -> vector<8x8xf32>
    %70 = arith.truncf %69 : vector<8x8xf32> to vector<8x8xbf16>
    %c0_34 = arith.constant 0 : index
    %c24 = arith.constant 24 : index
    %71 = vector.load %arg23[%c0_34, %c24] : memref<16x96xbf16, #tpu.memory_space<vmem>>, vector<8x8xbf16>
    %c0_35 = arith.constant 0 : index
    %c56 = arith.constant 56 : index
    %72 = vector.load %arg23[%c0_35, %c56] : memref<16x96xbf16, #tpu.memory_space<vmem>>, vector<8x8xbf16>
    %c0_36 = arith.constant 0 : index
    %c88 = arith.constant 88 : index
    %73 = vector.load %arg23[%c0_36, %c88] : memref<16x96xbf16, #tpu.memory_space<vmem>>, vector<8x8xbf16>
    %cst_37 = arith.constant dense<0.000000e+00> : vector<8x8xf32>
    %74 = tpu.matmul %71, %72, %cst_37 {dimension_numbers = #tpu.dot_dimension_numbers<[1], [1], [0], [0], [0, 0, 1, 0], [], []>} : vector<8x8xbf16>, vector<8x8xbf16>, vector<8x8xf32> -> vector<8x8xf32>
    %75 = vector.broadcast %13 : vector<1x8xf32> to vector<8x8xf32>
    %76 = arith.addf %74, %75 : vector<8x8xf32>
    %cst_38 = arith.constant dense<0xFF800000> : vector<8xf32>
    %77 = vector.multi_reduction <maximumf>, %76, %cst_38 [1] : vector<8x8xf32> to vector<8xf32>
    %78 = vector.shape_cast %77 : vector<8xf32> to vector<8x1xf32>
    %79 = vector.broadcast %78 : vector<8x1xf32> to vector<8x8xf32>
    %80 = arith.subf %76, %79 : vector<8x8xf32>
    %81 = math.exp %80 : vector<8x8xf32>
    %cst_39 = arith.constant dense<0.000000e+00> : vector<8xf32>
    %82 = vector.multi_reduction <add>, %81, %cst_39 [1] : vector<8x8xf32> to vector<8xf32>
    %83 = vector.shape_cast %82 : vector<8xf32> to vector<8x1xf32>
    %84 = tpu.reciprocal %83 {approx = true} : vector<8x1xf32> -> vector<8x1xf32>
    %85 = vector.broadcast %84 : vector<8x1xf32> to vector<8x8xf32>
    %86 = arith.mulf %81, %85 : vector<8x8xf32>
    %87 = arith.truncf %86 : vector<8x8xf32> to vector<8x8xbf16>
    %cst_40 = arith.constant dense<0.000000e+00> : vector<8x8xf32>
    %88 = tpu.matmul %87, %73, %cst_40 {dimension_numbers = #tpu.dot_dimension_numbers<[1], [0], [0], [1], [0, 0, 1, 1], [], []>} : vector<8x8xbf16>, vector<8x8xbf16>, vector<8x8xf32> -> vector<8x8xf32>
    %89 = arith.truncf %88 : vector<8x8xf32> to vector<8x8xbf16>
    %90 = tpu.concatenate %32, %51, %70, %89 in 1 : vector<8x8xbf16>, vector<8x8xbf16>, vector<8x8xbf16>, vector<8x8xbf16> -> vector<8x32xbf16>
    %c1 = arith.constant 1 : index
    %c0_41 = arith.constant 0 : index
    %91 = vector.load %arg2[%c1, %c0_41] : memref<2x8xf32, #tpu.memory_space<vmem>>, vector<1x8xf32>
    %c8_42 = arith.constant 8 : index
    %c0_43 = arith.constant 0 : index
    %92 = vector.load %arg23[%c8_42, %c0_43] : memref<16x96xbf16, #tpu.memory_space<vmem>>, vector<8x8xbf16>
    %c8_44 = arith.constant 8 : index
    %c32_45 = arith.constant 32 : index
    %93 = vector.load %arg23[%c8_44, %c32_45] : memref<16x96xbf16, #tpu.memory_space<vmem>>, vector<8x8xbf16>
    %c8_46 = arith.constant 8 : index
    %c64_47 = arith.constant 64 : index
    %94 = vector.load %arg23[%c8_46, %c64_47] : memref<16x96xbf16, #tpu.memory_space<vmem>>, vector<8x8xbf16>
    %cst_48 = arith.constant dense<0.000000e+00> : vector<8x8xf32>
    %95 = tpu.matmul %92, %93, %cst_48 {dimension_numbers = #tpu.dot_dimension_numbers<[1], [1], [0], [0], [0, 0, 1, 0], [], []>} : vector<8x8xbf16>, vector<8x8xbf16>, vector<8x8xf32> -> vector<8x8xf32>
    %96 = vector.broadcast %91 : vector<1x8xf32> to vector<8x8xf32>
    %97 = arith.addf %95, %96 : vector<8x8xf32>
    %cst_49 = arith.constant dense<0xFF800000> : vector<8xf32>
    %98 = vector.multi_reduction <maximumf>, %97, %cst_49 [1] : vector<8x8xf32> to vector<8xf32>
    %99 = vector.shape_cast %98 : vector<8xf32> to vector<8x1xf32>
    %100 = vector.broadcast %99 : vector<8x1xf32> to vector<8x8xf32>
    %101 = arith.subf %97, %100 : vector<8x8xf32>
    %102 = math.exp %101 : vector<8x8xf32>
    %cst_50 = arith.constant dense<0.000000e+00> : vector<8xf32>
    %103 = vector.multi_reduction <add>, %102, %cst_50 [1] : vector<8x8xf32> to vector<8xf32>
    %104 = vector.shape_cast %103 : vector<8xf32> to vector<8x1xf32>
    %105 = tpu.reciprocal %104 {approx = true} : vector<8x1xf32> -> vector<8x1xf32>
    %106 = vector.broadcast %105 : vector<8x1xf32> to vector<8x8xf32>
    %107 = arith.mulf %102, %106 : vector<8x8xf32>
    %108 = arith.truncf %107 : vector<8x8xf32> to vector<8x8xbf16>
    %cst_51 = arith.constant dense<0.000000e+00> : vector<8x8xf32>
    %109 = tpu.matmul %108, %94, %cst_51 {dimension_numbers = #tpu.dot_dimension_numbers<[1], [0], [0], [1], [0, 0, 1, 1], [], []>} : vector<8x8xbf16>, vector<8x8xbf16>, vector<8x8xf32> -> vector<8x8xf32>
    %110 = arith.truncf %109 : vector<8x8xf32> to vector<8x8xbf16>
    %c8_52 = arith.constant 8 : index
    %c8_53 = arith.constant 8 : index
    %111 = vector.load %arg23[%c8_52, %c8_53] : memref<16x96xbf16, #tpu.memory_space<vmem>>, vector<8x8xbf16>
    %c8_54 = arith.constant 8 : index
    %c40_55 = arith.constant 40 : index
    %112 = vector.load %arg23[%c8_54, %c40_55] : memref<16x96xbf16, #tpu.memory_space<vmem>>, vector<8x8xbf16>
    %c8_56 = arith.constant 8 : index
    %c72_57 = arith.constant 72 : index
    %113 = vector.load %arg23[%c8_56, %c72_57] : memref<16x96xbf16, #tpu.memory_space<vmem>>, vector<8x8xbf16>
    %cst_58 = arith.constant dense<0.000000e+00> : vector<8x8xf32>
    %114 = tpu.matmul %111, %112, %cst_58 {dimension_numbers = #tpu.dot_dimension_numbers<[1], [1], [0], [0], [0, 0, 1, 0], [], []>} : vector<8x8xbf16>, vector<8x8xbf16>, vector<8x8xf32> -> vector<8x8xf32>
    %115 = vector.broadcast %91 : vector<1x8xf32> to vector<8x8xf32>
    %116 = arith.addf %114, %115 : vector<8x8xf32>
    %cst_59 = arith.constant dense<0xFF800000> : vector<8xf32>
    %117 = vector.multi_reduction <maximumf>, %116, %cst_59 [1] : vector<8x8xf32> to vector<8xf32>
    %118 = vector.shape_cast %117 : vector<8xf32> to vector<8x1xf32>
    %119 = vector.broadcast %118 : vector<8x1xf32> to vector<8x8xf32>
    %120 = arith.subf %116, %119 : vector<8x8xf32>
    %121 = math.exp %120 : vector<8x8xf32>
    %cst_60 = arith.constant dense<0.000000e+00> : vector<8xf32>
    %122 = vector.multi_reduction <add>, %121, %cst_60 [1] : vector<8x8xf32> to vector<8xf32>
    %123 = vector.shape_cast %122 : vector<8xf32> to vector<8x1xf32>
    %124 = tpu.reciprocal %123 {approx = true} : vector<8x1xf32> -> vector<8x1xf32>
    %125 = vector.broadcast %124 : vector<8x1xf32> to vector<8x8xf32>
    %126 = arith.mulf %121, %125 : vector<8x8xf32>
    %127 = arith.truncf %126 : vector<8x8xf32> to vector<8x8xbf16>
    %cst_61 = arith.constant dense<0.000000e+00> : vector<8x8xf32>
    %128 = tpu.matmul %127, %113, %cst_61 {dimension_numbers = #tpu.dot_dimension_numbers<[1], [0], [0], [1], [0, 0, 1, 1], [], []>} : vector<8x8xbf16>, vector<8x8xbf16>, vector<8x8xf32> -> vector<8x8xf32>
    %129 = arith.truncf %128 : vector<8x8xf32> to vector<8x8xbf16>
    %c8_62 = arith.constant 8 : index
    %c16_63 = arith.constant 16 : index
    %130 = vector.load %arg23[%c8_62, %c16_63] : memref<16x96xbf16, #tpu.memory_space<vmem>>, vector<8x8xbf16>
    %c8_64 = arith.constant 8 : index
    %c48_65 = arith.constant 48 : index
    %131 = vector.load %arg23[%c8_64, %c48_65] : memref<16x96xbf16, #tpu.memory_space<vmem>>, vector<8x8xbf16>
    %c8_66 = arith.constant 8 : index
    %c80_67 = arith.constant 80 : index
    %132 = vector.load %arg23[%c8_66, %c80_67] : memref<16x96xbf16, #tpu.memory_space<vmem>>, vector<8x8xbf16>
    %cst_68 = arith.constant dense<0.000000e+00> : vector<8x8xf32>
    %133 = tpu.matmul %130, %131, %cst_68 {dimension_numbers = #tpu.dot_dimension_numbers<[1], [1], [0], [0], [0, 0, 1, 0], [], []>} : vector<8x8xbf16>, vector<8x8xbf16>, vector<8x8xf32> -> vector<8x8xf32>
    %134 = vector.broadcast %91 : vector<1x8xf32> to vector<8x8xf32>
    %135 = arith.addf %133, %134 : vector<8x8xf32>
    %cst_69 = arith.constant dense<0xFF800000> : vector<8xf32>
    %136 = vector.multi_reduction <maximumf>, %135, %cst_69 [1] : vector<8x8xf32> to vector<8xf32>
    %137 = vector.shape_cast %136 : vector<8xf32> to vector<8x1xf32>
    %138 = vector.broadcast %137 : vector<8x1xf32> to vector<8x8xf32>
    %139 = arith.subf %135, %138 : vector<8x8xf32>
    %140 = math.exp %139 : vector<8x8xf32>
    %cst_70 = arith.constant dense<0.000000e+00> : vector<8xf32>
    %141 = vector.multi_reduction <add>, %140, %cst_70 [1] : vector<8x8xf32> to vector<8xf32>
    %142 = vector.shape_cast %141 : vector<8xf32> to vector<8x1xf32>
    %143 = tpu.reciprocal %142 {approx = true} : vector<8x1xf32> -> vector<8x1xf32>
    %144 = vector.broadcast %143 : vector<8x1xf32> to vector<8x8xf32>
    %145 = arith.mulf %140, %144 : vector<8x8xf32>
    %146 = arith.truncf %145 : vector<8x8xf32> to vector<8x8xbf16>
    %cst_71 = arith.constant dense<0.000000e+00> : vector<8x8xf32>
    %147 = tpu.matmul %146, %132, %cst_71 {dimension_numbers = #tpu.dot_dimension_numbers<[1], [0], [0], [1], [0, 0, 1, 1], [], []>} : vector<8x8xbf16>, vector<8x8xbf16>, vector<8x8xf32> -> vector<8x8xf32>
    %148 = arith.truncf %147 : vector<8x8xf32> to vector<8x8xbf16>
    %c8_72 = arith.constant 8 : index
    %c24_73 = arith.constant 24 : index
    %149 = vector.load %arg23[%c8_72, %c24_73] : memref<16x96xbf16, #tpu.memory_space<vmem>>, vector<8x8xbf16>
    %c8_74 = arith.constant 8 : index
    %c56_75 = arith.constant 56 : index
    %150 = vector.load %arg23[%c8_74, %c56_75] : memref<16x96xbf16, #tpu.memory_space<vmem>>, vector<8x8xbf16>
    %c8_76 = arith.constant 8 : index
    %c88_77 = arith.constant 88 : index
    %151 = vector.load %arg23[%c8_76, %c88_77] : memref<16x96xbf16, #tpu.memory_space<vmem>>, vector<8x8xbf16>
    %cst_78 = arith.constant dense<0.000000e+00> : vector<8x8xf32>
    %152 = tpu.matmul %149, %150, %cst_78 {dimension_numbers = #tpu.dot_dimension_numbers<[1], [1], [0], [0], [0, 0, 1, 0], [], []>} : vector<8x8xbf16>, vector<8x8xbf16>, vector<8x8xf32> -> vector<8x8xf32>
    %153 = vector.broadcast %91 : vector<1x8xf32> to vector<8x8xf32>
    %154 = arith.addf %152, %153 : vector<8x8xf32>
    %cst_79 = arith.constant dense<0xFF800000> : vector<8xf32>
    %155 = vector.multi_reduction <maximumf>, %154, %cst_79 [1] : vector<8x8xf32> to vector<8xf32>
    %156 = vector.shape_cast %155 : vector<8xf32> to vector<8x1xf32>
    %157 = vector.broadcast %156 : vector<8x1xf32> to vector<8x8xf32>
    %158 = arith.subf %154, %157 : vector<8x8xf32>
    %159 = math.exp %158 : vector<8x8xf32>
    %cst_80 = arith.constant dense<0.000000e+00> : vector<8xf32>
    %160 = vector.multi_reduction <add>, %159, %cst_80 [1] : vector<8x8xf32> to vector<8xf32>
    %161 = vector.shape_cast %160 : vector<8xf32> to vector<8x1xf32>
    %162 = tpu.reciprocal %161 {approx = true} : vector<8x1xf32> -> vector<8x1xf32>
    %163 = vector.broadcast %162 : vector<8x1xf32> to vector<8x8xf32>
    %164 = arith.mulf %159, %163 : vector<8x8xf32>
    %165 = arith.truncf %164 : vector<8x8xf32> to vector<8x8xbf16>
    %cst_81 = arith.constant dense<0.000000e+00> : vector<8x8xf32>
    %166 = tpu.matmul %165, %151, %cst_81 {dimension_numbers = #tpu.dot_dimension_numbers<[1], [0], [0], [1], [0, 0, 1, 1], [], []>} : vector<8x8xbf16>, vector<8x8xbf16>, vector<8x8xf32> -> vector<8x8xf32>
    %167 = arith.truncf %166 : vector<8x8xf32> to vector<8x8xbf16>
    %168 = tpu.concatenate %110, %129, %148, %167 in 1 : vector<8x8xbf16>, vector<8x8xbf16>, vector<8x8xbf16>, vector<8x8xbf16> -> vector<8x32xbf16>
    %169 = tpu.concatenate %90, %168 in 0 : vector<8x32xbf16>, vector<8x32xbf16> -> vector<16x32xbf16>
    %c0_82 = arith.constant 0 : index
    %c0_83 = arith.constant 0 : index
    %c0_84 = arith.constant 0 : index
    %170 = vector.load %arg7[%c0_82, %c0_83, %c0_84] : memref<1x32x32xbf16, #tpu.memory_space<vmem>>, vector<1x32x32xbf16>
    %171 = vector.shape_cast %170 : vector<1x32x32xbf16> to vector<32x32xbf16>
    %cst_85 = arith.constant dense<0.000000e+00> : vector<16x32xf32>
    %172 = tpu.matmul %169, %171, %cst_85 {dimension_numbers = #tpu.dot_dimension_numbers<[1], [0], [0], [1], [0, 0, 1, 1], [], []>} : vector<16x32xbf16>, vector<32x32xbf16>, vector<16x32xf32> -> vector<16x32xf32>
    %c0_86 = arith.constant 0 : index
    %c0_87 = arith.constant 0 : index
    %c0_88 = arith.constant 0 : index
    %173 = vector.load %arg8[%c0_86, %c0_87, %c0_88] : memref<1x1x32xf32, #tpu.memory_space<vmem>>, vector<1x1x32xf32>
    %174 = vector.shape_cast %173 : vector<1x1x32xf32> to vector<1x32xf32>
    %175 = vector.broadcast %174 : vector<1x32xf32> to vector<16x32xf32>
    %176 = arith.addf %172, %175 : vector<16x32xf32>
    %c0_89 = arith.constant 0 : index
    %c0_90 = arith.constant 0 : index
    %177 = vector.load %arg22[%c0_89, %c0_90] : memref<16x32xbf16, #tpu.memory_space<vmem>>, vector<16x32xbf16>
    %178 = arith.extf %177 : vector<16x32xbf16> to vector<16x32xf32>
    %179 = arith.addf %176, %178 : vector<16x32xf32>
    %c0_91 = arith.constant 0 : index
    %c0_92 = arith.constant 0 : index
    %c0_93 = arith.constant 0 : index
    %180 = vector.load %arg9[%c0_91, %c0_92, %c0_93] : memref<1x1x32xf32, #tpu.memory_space<vmem>>, vector<1x1x32xf32>
    %181 = vector.shape_cast %180 : vector<1x1x32xf32> to vector<1x32xf32>
    %c0_94 = arith.constant 0 : index
    %c0_95 = arith.constant 0 : index
    %c0_96 = arith.constant 0 : index
    %182 = vector.load %arg10[%c0_94, %c0_95, %c0_96] : memref<1x1x32xf32, #tpu.memory_space<vmem>>, vector<1x1x32xf32>
    %183 = vector.shape_cast %182 : vector<1x1x32xf32> to vector<1x32xf32>
    %cst_97 = arith.constant dense<0.000000e+00> : vector<16xf32>
    %184 = vector.multi_reduction <add>, %179, %cst_97 [1] : vector<16x32xf32> to vector<16xf32>
    %185 = vector.shape_cast %184 : vector<16xf32> to vector<16x1xf32>
    %cst_98 = arith.constant 3.200000e+01 : f32
    %186 = vector.broadcast %cst_98 : f32 to vector<16x1xf32>
    %187 = arith.divf %185, %186 : vector<16x1xf32>
    %188 = vector.broadcast %187 : vector<16x1xf32> to vector<16x32xf32>
    %189 = arith.subf %179, %188 : vector<16x32xf32>
    %190 = arith.mulf %189, %189 : vector<16x32xf32>
    %cst_99 = arith.constant dense<0.000000e+00> : vector<16xf32>
    %191 = vector.multi_reduction <add>, %190, %cst_99 [1] : vector<16x32xf32> to vector<16xf32>
    %192 = vector.shape_cast %191 : vector<16xf32> to vector<16x1xf32>
    %cst_100 = arith.constant 3.200000e+01 : f32
    %193 = vector.broadcast %cst_100 : f32 to vector<16x1xf32>
    %194 = arith.divf %192, %193 : vector<16x1xf32>
    %195 = vector.broadcast %187 : vector<16x1xf32> to vector<16x32xf32>
    %196 = arith.subf %179, %195 : vector<16x32xf32>
    %cst_101 = arith.constant 9.99999996E-13 : f32
    %197 = vector.broadcast %cst_101 : f32 to vector<16x1xf32>
    %198 = arith.addf %194, %197 : vector<16x1xf32>
    %199 = math.rsqrt %198 : vector<16x1xf32>
    %200 = vector.broadcast %199 : vector<16x1xf32> to vector<16x32xf32>
    %201 = arith.mulf %196, %200 : vector<16x32xf32>
    %202 = vector.broadcast %181 : vector<1x32xf32> to vector<16x32xf32>
    %203 = arith.mulf %201, %202 : vector<16x32xf32>
    %204 = vector.broadcast %183 : vector<1x32xf32> to vector<16x32xf32>
    %205 = arith.addf %203, %204 : vector<16x32xf32>
    %206 = arith.truncf %205 : vector<16x32xf32> to vector<16x32xbf16>
    %c0_102 = arith.constant 0 : index
    %c0_103 = arith.constant 0 : index
    %c0_104 = arith.constant 0 : index
    %207 = vector.load %arg11[%c0_102, %c0_103, %c0_104] : memref<1x32x64xbf16, #tpu.memory_space<vmem>>, vector<1x32x64xbf16>
    %208 = vector.shape_cast %207 : vector<1x32x64xbf16> to vector<32x64xbf16>
    %cst_105 = arith.constant dense<0.000000e+00> : vector<16x64xf32>
    %209 = tpu.matmul %206, %208, %cst_105 {dimension_numbers = #tpu.dot_dimension_numbers<[1], [0], [0], [1], [0, 0, 1, 1], [], []>} : vector<16x32xbf16>, vector<32x64xbf16>, vector<16x64xf32> -> vector<16x64xf32>
    %c0_106 = arith.constant 0 : index
    %c0_107 = arith.constant 0 : index
    %c0_108 = arith.constant 0 : index
    %210 = vector.load %arg12[%c0_106, %c0_107, %c0_108] : memref<1x1x64xf32, #tpu.memory_space<vmem>>, vector<1x1x64xf32>
    %211 = vector.shape_cast %210 : vector<1x1x64xf32> to vector<1x64xf32>
    %212 = vector.broadcast %211 : vector<1x64xf32> to vector<16x64xf32>
    %213 = arith.addf %209, %212 : vector<16x64xf32>
    %214 = arith.mulf %213, %213 : vector<16x64xf32>
    %215 = arith.mulf %213, %214 : vector<16x64xf32>
    %cst_109 = arith.constant 4.471500e-02 : f32
    %216 = vector.broadcast %cst_109 : f32 to vector<16x64xf32>
    %217 = arith.mulf %216, %215 : vector<16x64xf32>
    %218 = arith.addf %213, %217 : vector<16x64xf32>
    %cst_110 = arith.constant 0.797884583 : f32
    %219 = vector.broadcast %cst_110 : f32 to vector<16x64xf32>
    %220 = arith.mulf %219, %218 : vector<16x64xf32>
    %221 = math.tanh %220 : vector<16x64xf32>
    %cst_111 = arith.constant 1.000000e+00 : f32
    %222 = vector.broadcast %cst_111 : f32 to vector<16x64xf32>
    %223 = arith.addf %222, %221 : vector<16x64xf32>
    %cst_112 = arith.constant 5.000000e-01 : f32
    %224 = vector.broadcast %cst_112 : f32 to vector<16x64xf32>
    %225 = arith.mulf %224, %223 : vector<16x64xf32>
    %226 = arith.mulf %213, %225 : vector<16x64xf32>
    %227 = arith.truncf %226 : vector<16x64xf32> to vector<16x64xbf16>
    %c0_113 = arith.constant 0 : index
    %c0_114 = arith.constant 0 : index
    %c0_115 = arith.constant 0 : index
    %228 = vector.load %arg13[%c0_113, %c0_114, %c0_115] : memref<1x64x32xbf16, #tpu.memory_space<vmem>>, vector<1x64x32xbf16>
    %229 = vector.shape_cast %228 : vector<1x64x32xbf16> to vector<64x32xbf16>
    %cst_116 = arith.constant dense<0.000000e+00> : vector<16x32xf32>
    %230 = tpu.matmul %227, %229, %cst_116 {dimension_numbers = #tpu.dot_dimension_numbers<[1], [0], [0], [1], [0, 0, 1, 1], [], []>} : vector<16x64xbf16>, vector<64x32xbf16>, vector<16x32xf32> -> vector<16x32xf32>
    %c0_117 = arith.constant 0 : index
    %c0_118 = arith.constant 0 : index
    %c0_119 = arith.constant 0 : index
    %231 = vector.load %arg14[%c0_117, %c0_118, %c0_119] : memref<1x1x32xf32, #tpu.memory_space<vmem>>, vector<1x1x32xf32>
    %232 = vector.shape_cast %231 : vector<1x1x32xf32> to vector<1x32xf32>
    %233 = vector.broadcast %232 : vector<1x32xf32> to vector<16x32xf32>
    %234 = arith.addf %230, %233 : vector<16x32xf32>
    %235 = arith.addf %234, %205 : vector<16x32xf32>
    %c0_120 = arith.constant 0 : index
    %c0_121 = arith.constant 0 : index
    %c0_122 = arith.constant 0 : index
    %236 = vector.load %arg15[%c0_120, %c0_121, %c0_122] : memref<1x1x32xf32, #tpu.memory_space<vmem>>, vector<1x1x32xf32>
    %237 = vector.shape_cast %236 : vector<1x1x32xf32> to vector<1x32xf32>
    %c0_123 = arith.constant 0 : index
    %c0_124 = arith.constant 0 : index
    %c0_125 = arith.constant 0 : index
    %238 = vector.load %arg16[%c0_123, %c0_124, %c0_125] : memref<1x1x32xf32, #tpu.memory_space<vmem>>, vector<1x1x32xf32>
    %239 = vector.shape_cast %238 : vector<1x1x32xf32> to vector<1x32xf32>
    %cst_126 = arith.constant dense<0.000000e+00> : vector<16xf32>
    %240 = vector.multi_reduction <add>, %235, %cst_126 [1] : vector<16x32xf32> to vector<16xf32>
    %241 = vector.shape_cast %240 : vector<16xf32> to vector<16x1xf32>
    %cst_127 = arith.constant 3.200000e+01 : f32
    %242 = vector.broadcast %cst_127 : f32 to vector<16x1xf32>
    %243 = arith.divf %241, %242 : vector<16x1xf32>
    %244 = vector.broadcast %243 : vector<16x1xf32> to vector<16x32xf32>
    %245 = arith.subf %235, %244 : vector<16x32xf32>
    %246 = arith.mulf %245, %245 : vector<16x32xf32>
    %cst_128 = arith.constant dense<0.000000e+00> : vector<16xf32>
    %247 = vector.multi_reduction <add>, %246, %cst_128 [1] : vector<16x32xf32> to vector<16xf32>
    %248 = vector.shape_cast %247 : vector<16xf32> to vector<16x1xf32>
    %cst_129 = arith.constant 3.200000e+01 : f32
    %249 = vector.broadcast %cst_129 : f32 to vector<16x1xf32>
    %250 = arith.divf %248, %249 : vector<16x1xf32>
    %251 = vector.broadcast %243 : vector<16x1xf32> to vector<16x32xf32>
    %252 = arith.subf %235, %251 : vector<16x32xf32>
    %cst_130 = arith.constant 9.99999996E-13 : f32
    %253 = vector.broadcast %cst_130 : f32 to vector<16x1xf32>
    %254 = arith.addf %250, %253 : vector<16x1xf32>
    %255 = math.rsqrt %254 : vector<16x1xf32>
    %256 = vector.broadcast %255 : vector<16x1xf32> to vector<16x32xf32>
    %257 = arith.mulf %252, %256 : vector<16x32xf32>
    %258 = vector.broadcast %237 : vector<1x32xf32> to vector<16x32xf32>
    %259 = arith.mulf %257, %258 : vector<16x32xf32>
    %260 = vector.broadcast %239 : vector<1x32xf32> to vector<16x32xf32>
    %261 = arith.addf %259, %260 : vector<16x32xf32>
    %262 = arith.truncf %261 : vector<16x32xf32> to vector<16x32xbf16>
    %c0_131 = arith.constant 0 : index
    %c0_132 = arith.constant 0 : index
    %263 = vector.load %arg22[%c0_131, %c0_132] : memref<16x32xbf16, #tpu.memory_space<vmem>>, vector<16x32xbf16>
    tpu.vector_store %arg22[%c0_131, %c0_132], %262 {strides = array<i32>} : memref<16x32xbf16, #tpu.memory_space<vmem>>, vector<16x32xbf16>,
    %c1_i32 = arith.constant 1 : i32
    %264 = arith.cmpi eq, %arg0, %c1_i32 : i32
    %265 = arith.extui %264 : i1 to i32
    %c0_i32_133 = arith.constant 0 : i32
    %266 = arith.cmpi ne, %265, %c0_i32_133 : i32
    scf.if %266 {
      %267 = vector.extract_strided_slice %261 {offsets = [0, 0], sizes = [1, 32], strides = [1, 1]} : vector<16x32xf32> to vector<1x32xf32>
      %268 = vector.extract_strided_slice %261 {offsets = [8, 0], sizes = [1, 32], strides = [1, 1]} : vector<16x32xf32> to vector<1x32xf32>
      %269 = tpu.concatenate %267, %268 in 0 : vector<1x32xf32>, vector<1x32xf32> -> vector<2x32xf32>
      %c0_134 = arith.constant 0 : index
      %c0_135 = arith.constant 0 : index
      %270 = vector.load %arg17[%c0_134, %c0_135] : memref<32x32xf32, #tpu.memory_space<vmem>>, vector<32x32xf32>
      %cst_136 = arith.constant dense<0.000000e+00> : vector<2x32xf32>
      %271 = tpu.matmul %269, %270, %cst_136 {dimension_numbers = #tpu.dot_dimension_numbers<[1], [0], [0], [1], [0, 0, 1, 1], [], []>} : vector<2x32xf32>, vector<32x32xf32>, vector<2x32xf32> -> vector<2x32xf32>
      %c0_137 = arith.constant 0 : index
      %c0_138 = arith.constant 0 : index
      %272 = vector.load %arg18[%c0_137, %c0_138] : memref<1x32xf32, #tpu.memory_space<vmem>>, vector<1x32xf32>
      %273 = vector.broadcast %272 : vector<1x32xf32> to vector<2x32xf32>
      %274 = arith.addf %271, %273 : vector<2x32xf32>
      %275 = math.tanh %274 : vector<2x32xf32>
      %c0_139 = arith.constant 0 : index
      %c0_140 = arith.constant 0 : index
      %276 = vector.load %arg19[%c0_139, %c0_140] : memref<32x3xf32, #tpu.memory_space<vmem>>, vector<32x3xf32>
      %cst_141 = arith.constant dense<0.000000e+00> : vector<2x3xf32>
      %277 = tpu.matmul %275, %276, %cst_141 {dimension_numbers = #tpu.dot_dimension_numbers<[1], [0], [0], [1], [0, 0, 1, 1], [], []>} : vector<2x32xf32>, vector<32x3xf32>, vector<2x3xf32> -> vector<2x3xf32>
      %c0_142 = arith.constant 0 : index
      %c0_143 = arith.constant 0 : index
      %278 = vector.load %arg20[%c0_142, %c0_143] : memref<1x3xf32, #tpu.memory_space<vmem>>, vector<1x3xf32>
      %279 = vector.broadcast %278 : vector<1x3xf32> to vector<2x3xf32>
      %280 = arith.addf %277, %279 : vector<2x3xf32>
      %c0_144 = arith.constant 0 : index
      %c0_145 = arith.constant 0 : index
      %281 = vector.load %arg21[%c0_144, %c0_145] : memref<2x3xf32, #tpu.memory_space<vmem>>, vector<2x3xf32>
      tpu.vector_store %arg21[%c0_144, %c0_145], %280 {strides = array<i32>} : memref<2x3xf32, #tpu.memory_space<vmem>>, vector<2x3xf32>,
    } else {
    }
    return
  }
  func.func @transform_0(%arg0: i32) -> (i32, i32) {
    %c0_i32 = arith.constant 0 : i32
    %c0_i32_0 = arith.constant 0 : i32
    %c0_i32_1 = arith.constant 0 : i32
    return %c0_i32, %c0_i32_0 : i32, i32
  }
  func.func @transform_1(%arg0: i32) -> (i32, i32) {
    %c0_i32 = arith.constant 0 : i32
    %c0_i32_0 = arith.constant 0 : i32
    %c0_i32_1 = arith.constant 0 : i32
    return %c0_i32, %c0_i32_0 : i32, i32
  }
  func.func @transform_2(%arg0: i32) -> (i32, i32) {
    %c0_i32 = arith.constant 0 : i32
    %c0_i32_0 = arith.constant 0 : i32
    %c0_i32_1 = arith.constant 0 : i32
    return %c0_i32, %c0_i32_0 : i32, i32
  }
  func.func @transform_3(%arg0: i32) -> (i32, i32) {
    %c0_i32 = arith.constant 0 : i32
    %c0_i32_0 = arith.constant 0 : i32
    %c0_i32_1 = arith.constant 0 : i32
    return %c0_i32, %c0_i32_0 : i32, i32
  }
  func.func @transform_4(%arg0: i32) -> (i32, i32, i32) {
    %c0_i32 = arith.constant 0 : i32
    %c0_i32_0 = arith.constant 0 : i32
    %c0_i32_1 = arith.constant 0 : i32
    return %arg0, %c0_i32, %c0_i32_0 : i32, i32, i32
  }
  func.func @transform_5(%arg0: i32) -> (i32, i32, i32) {
    %c0_i32 = arith.constant 0 : i32
    %c0_i32_0 = arith.constant 0 : i32
    %c0_i32_1 = arith.constant 0 : i32
    return %arg0, %c0_i32, %c0_i32_0 : i32, i32, i32
  }
  func.func @transform_6(%arg0: i32) -> (i32, i32, i32) {
    %c0_i32 = arith.constant 0 : i32
    %c0_i32_0 = arith.constant 0 : i32
    %c0_i32_1 = arith.constant 0 : i32
    return %arg0, %c0_i32, %c0_i32_0 : i32, i32, i32
  }
  func.func @transform_7(%arg0: i32) -> (i32, i32, i32) {
    %c0_i32 = arith.constant 0 : i32
    %c0_i32_0 = arith.constant 0 : i32
    %c0_i32_1 = arith.constant 0 : i32
    return %arg0, %c0_i32, %c0_i32_0 : i32, i32, i32
  }
  func.func @transform_8(%arg0: i32) -> (i32, i32, i32) {
    %c0_i32 = arith.constant 0 : i32
    %c0_i32_0 = arith.constant 0 : i32
    %c0_i32_1 = arith.constant 0 : i32
    return %arg0, %c0_i32, %c0_i32_0 : i32, i32, i32
  }
  func.func @transform_9(%arg0: i32) -> (i32, i32, i32) {
    %c0_i32 = arith.constant 0 : i32
    %c0_i32_0 = arith.constant 0 : i32
    %c0_i32_1 = arith.constant 0 : i32
    return %arg0, %c0_i32, %c0_i32_0 : i32, i32, i32
  }
  func.func @transform_10(%arg0: i32) -> (i32, i32, i32) {
    %c0_i32 = arith.constant 0 : i32
    %c0_i32_0 = arith.constant 0 : i32
    %c0_i32_1 = arith.constant 0 : i32
    return %arg0, %c0_i32, %c0_i32_0 : i32, i32, i32
  }
  func.func @transform_11(%arg0: i32) -> (i32, i32, i32) {
    %c0_i32 = arith.constant 0 : i32
    %c0_i32_0 = arith.constant 0 : i32
    %c0_i32_1 = arith.constant 0 : i32
    return %arg0, %c0_i32, %c0_i32_0 : i32, i32, i32
  }
  func.func @transform_12(%arg0: i32) -> (i32, i32, i32) {
    %c0_i32 = arith.constant 0 : i32
    %c0_i32_0 = arith.constant 0 : i32
    %c0_i32_1 = arith.constant 0 : i32
    return %arg0, %c0_i32, %c0_i32_0 : i32, i32, i32
  }
  func.func @transform_13(%arg0: i32) -> (i32, i32, i32) {
    %c0_i32 = arith.constant 0 : i32
    %c0_i32_0 = arith.constant 0 : i32
    %c0_i32_1 = arith.constant 0 : i32
    return %arg0, %c0_i32, %c0_i32_0 : i32, i32, i32
  }
  func.func @transform_14(%arg0: i32) -> (i32, i32, i32) {
    %c0_i32 = arith.constant 0 : i32
    %c0_i32_0 = arith.constant 0 : i32
    %c0_i32_1 = arith.constant 0 : i32
    return %arg0, %c0_i32, %c0_i32_0 : i32, i32, i32
  }
  func.func @transform_15(%arg0: i32) -> (i32, i32, i32) {
    %c0_i32 = arith.constant 0 : i32
    %c0_i32_0 = arith.constant 0 : i32
    %c0_i32_1 = arith.constant 0 : i32
    return %arg0, %c0_i32, %c0_i32_0 : i32, i32, i32
  }
  func.func @transform_16(%arg0: i32) -> (i32, i32) {
    %c0_i32 = arith.constant 0 : i32
    %c0_i32_0 = arith.constant 0 : i32
    %c0_i32_1 = arith.constant 0 : i32
    return %c0_i32, %c0_i32_0 : i32, i32
  }
  func.func @transform_17(%arg0: i32) -> (i32, i32) {
    %c0_i32 = arith.constant 0 : i32
    %c0_i32_0 = arith.constant 0 : i32
    %c0_i32_1 = arith.constant 0 : i32
    return %c0_i32, %c0_i32_0 : i32, i32
  }
  func.func @transform_18(%arg0: i32) -> (i32, i32) {
    %c0_i32 = arith.constant 0 : i32
    %c0_i32_0 = arith.constant 0 : i32
    %c0_i32_1 = arith.constant 0 : i32
    return %c0_i32, %c0_i32_0 : i32, i32
  }
  func.func @transform_19(%arg0: i32) -> (i32, i32) {
    %c0_i32 = arith.constant 0 : i32
    %c0_i32_0 = arith.constant 0 : i32
    %c0_i32_1 = arith.constant 0 : i32
    return %c0_i32, %c0_i32_0 : i32, i32
  }
  func.func @transform_20(%arg0: i32) -> (i32, i32) {
    %c0_i32 = arith.constant 0 : i32
    %c0_i32_0 = arith.constant 0 : i32
    %c0_i32_1 = arith.constant 0 : i32
    return %c0_i32, %c0_i32_0 : i32, i32
  }
}

</mosaic_0001>

<bundles_post_ra>
// kernel: bert_classifier_forward.1
= control target key start
LH: loop header
LB: loop body
LE: loop exit
PB: predicated region body
PF: predicated region fallthrough
CT: control target
= control target key end

     0   :  { %s3489_s0 = inlined_call_operand.vmem [shape: f32[16,32], index: 0, kind: input, shape index: {}]   ;;  %s3490_s1 = inlined_call_operand.vmem [shape: f32[2,8], index: 1, kind: input, shape index: {}]   ;;  %s3491_s2 = inlined_call_operand.vmem [shape: f32[1,32], index: 2, kind: input, shape index: {}]   ;;  %s3492_s3 = inlined_call_operand.vmem [shape: f32[1,32], index: 3, kind: input, shape index: {}]   ;;  %s3493_s4 = inlined_call_operand.vmem [shape: bf16[2,32,96], index: 4, kind: input, shape index: {}]   ;;  %s3494_s5 = inlined_call_operand.vmem [shape: f32[2,1,96], index: 5, kind: input, shape index: {}]   ;;  %s3495_s6 = inlined_call_operand.vmem [shape: bf16[2,32,32], index: 6, kind: input, shape index: {}]   ;;  %s3496_s7 = inlined_call_operand.vmem [shape: f32[2,1,32], index: 7, kind: input, shape index: {}]   ;;  %s3497_s8 = inlined_call_operand.vmem [shape: f32[2,1,32], index: 8, kind: input, shape index: {}]   ;;  %s3498_s9 = inlined_call_operand.vmem [shape: f32[2,1,32], index: 9, kind: input, shape index: {}]   ;;  %s3499_s10 = inlined_call_operand.vmem [shape: bf16[2,32,64], index: 10, kind: input, shape index: {}]   ;;  %s3500_s11 = inlined_call_operand.vmem [shape: f32[2,1,64], index: 11, kind: input, shape index: {}]   ;;  %s3501_s12 = inlined_call_operand.vmem [shape: bf16[2,64,32], index: 12, kind: input, shape index: {}]   ;;  %s3502_s13 = inlined_call_operand.vmem [shape: f32[2,1,32], index: 13, kind: input, shape index: {}]   ;;  %s3503_s14 = inlined_call_operand.vmem [shape: f32[2,1,32], index: 14, kind: input, shape index: {}]   ;;  %s3504_s15 = inlined_call_operand.vmem [shape: f32[2,1,32], index: 15, kind: input, shape index: {}]   ;;  %s3505_s16 = inlined_call_operand.vmem [shape: f32[32,32], index: 16, kind: input, shape index: {}]   ;;  %s3506_s17 = inlined_call_operand.vmem [shape: f32[1,32], index: 17, kind: input, shape index: {}]   ;;  %s3507_s18 = inlined_call_operand.vmem [shape: f32[32,3], index: 18, kind: input, shape index: {}]   ;;  %s3508_s19 = inlined_call_operand.vmem [shape: f32[1,3], index: 19, kind: input, shape index: {}]   ;;  %s3509_s20 = inlined_call_operand.hbm [shape: f32[2,3], index: 20, kind: output, shape index: {}]  }
   0x1   :  { %3516 = sst [smem:[#allocation8_spill]] %s3489_s0 }
   0x2   :  { %3517 = sst [smem:[#allocation9_spill]] %s3490_s1 }
   0x3   :  { %3518 = sst [smem:[#allocation10_spill]] %s3491_s2 }
   0x4   :  { %3519 = sst [smem:[#allocation11_spill]] %s3492_s3 }
   0x5   :  { %3520 = sst [smem:[#allocation12_spill]] %s3493_s4 }
   0x6   :  { %3521 = sst [smem:[#allocation13_spill]] %s3495_s6 }
   0x7   :  { %3522 = sst [smem:[#allocation14_spill]] %s3505_s16 }
   0x8   :  { %3523 = sst [smem:[#allocation15_spill]] %s3506_s17 }
   0x9   :  { %3524 = sst [smem:[#allocation16_spill]] %s3507_s18 }
   0xa   :  { %3525 = sst [smem:[#allocation17_spill]] %s3508_s19 }
   0xb   :  { %3526 = sst [smem:[#allocation18_spill]] %s3509_s20 }
   0xc   :  { %25 = vsyncpa [#allocation5], 0  ;;  %s3070_s1 = smov 0  }
   0xd LB: > { %3527 = sst [smem:[#allocation7_spill]] %s2943_s1  ;;  %s3076_s22 = sadd.s32 4294967295, %s2943_s1   ;;  %s2943_s1 = sphi %s3070_s1, %s31_s1  }
   0xe   : > { %p2526_p0 = scmp.ge.s32.totalorder %s2943_s1, 1  ;;  %p652_p1 = scmp.lt.s32.totalorder %s2943_s1, 3 }
  0x10   : > { %p653_p2 = pnand %p2526_p0, %p652_p1 }
  0x11   : > { %p744_p3 = scmp.lt.s32.totalorder (!%p653_p2), %s3076_s22, 1  ;;  %s3528_s28 = sld [smem:[#allocation12_spill]] (!%p653_p2) }
  0x12   : > { %656 = sbr.rel (%p653_p2) target bundleno = 3471 (0xd8f), region = 100  ;;  %s3529_s6 = sld [smem:[#allocation13_spill]] (!%p653_p2) }
  0x13   : > { %p2535_p4 = scmp.ne.s32.totalorder (!%p653_p2), %s3076_s22, 0 }
  0x19   : > { %s3082_s23 = scalar_select %p744_p3, %s3076_s22, 1 }
  0x1a   : > { %792 = sbr.rel (%p2535_p4) target bundleno = 353 (0x161), region = 104  ;;  %s3530_s1 = sld [smem:[#allocation8_spill]] (!%p2535_p4)  ;;  %vm797_vm0 = vcmask (!%p2535_p4), 261120  }
  0x1b   : > { %s2587_s24 = sshll.u32 %s3082_s23, 4  ;;  %s2590_s16 = sshll.u32 %s3082_s23, 5 }
  0x1c   : > { %s3092_s4 = scalar_lea.vmem %s3528_s28, %s2587_s24  ;;  %s3097_s0 = scalar_lea.vmem %s3529_s6, %s2587_s24 }
  0x1d   : > { %s3114_s28 = scalar_lea.vmem %s3499_s10, %s2587_s24  ;;  %s3124_s20 = scalar_lea.vmem %s3501_s12, %s2590_s16 }
  0x1e   : > { %s781_s2 = scalar_lea.vmem %s3502_s13, %s3082_s23  ;;  %s784_s26 = scalar_lea.vmem %s3503_s14, %s3082_s23 }
  0x1f   : > { %s787_s18 = scalar_lea.vmem %s3504_s15, %s3082_s23  ;;  %s3532_s17 = sld [smem:[#allocation10_spill]] (!%p2535_p4) }
  0x20   : > { %s3531_s21 = smov (!%p2535_p4), %s3530_s1  ;;  %v793_v0 = vld [vmem:[%s3530_s1] sm:$0xff] (!%p2535_p4)  ;;  %s3533_s24 = sld [smem:[#allocation11_spill]] (!%p2535_p4) }
  0x21   : > { %v794_v1 = vld [vmem:[%s3531_s21 + $0x8] sm:$0xff]  ;;  %v798_v2 = vsel %vm797_vm0, %v793_v0, 0.0 }
  0x22   : > { %799 = vadd.xlane.f32.xlu0 %v798_v2  ;;  %v801_v3 = vsel %vm797_vm0, %v794_v1, 0.0 }
  0x25   : > { %v2536_v22 = vld [vmem:[%s3532_s17] ss:$0 sm:$0xff] }
  0x26   : > { %802 = vadd.xlane.f32.xlu0 %v801_v3  ;;  %v2537_v26 = vld [vmem:[%s3533_s24] ss:$0 sm:$0xff] }
  0xaf   : > { %v800_v4 = vpop.xlane.xlu0 %799 }
  0xb0   : > { %v805_v5 = vmul.f32 0.03125, %v800_v4 }
  0xb2   : > { %v807_v6 = vsub.f32 %v793_v0, %v805_v5 }
  0xb3   : > { %v803_v7 = vpop.xlane.xlu0 %802 }
  0xb4   : > { %v806_v8 = vmul.f32 0.03125, %v803_v7  ;;  %v809_v9 = vmul.f32 %v807_v6, %v807_v6 }
  0xb6   : > { %v808_v10 = vsub.f32 %v794_v1, %v806_v8  ;;  %v811_v11 = vsel %vm797_vm0, %v809_v9, 0.0 }
  0xb7   : > { %812 = vadd.xlane.f32.xlu1 %v811_v11 }
  0xb8   : > { %v810_v12 = vmul.f32 %v808_v10, %v808_v10 }
  0xba   : > { %v814_v13 = vsel %vm797_vm0, %v810_v12, 0.0 }
  0xbb   : > { %815 = vadd.xlane.f32.xlu1 %v814_v13 }
 0x144   : > { %v813_v14 = vpop.xlane.xlu1 %812 }
 0x145   : > { %v817_v15 = vmul.f32 0.03125, %v813_v14 }
 0x147   : > { %v819_v16 = vadd.f32 1e-12, %v817_v15 }
 0x148   : > { %v816_v17 = vpop.xlane.xlu1 %815 }
 0x149   : > { %2847 = vrsqrt.f32 %v819_v16  ;;  %v818_v18 = vmul.f32 0.03125, %v816_v17 }
 0x14b   : > { %v820_v19 = vadd.f32 1e-12, %v818_v18 }
 0x14d   : > { %2849 = vrsqrt.f32 %v820_v19 }
 0x153   : > { %v2848_v20 = vpop.eup %2847 }
 0x154   : > { %v823_v21 = vmul.f32 %v2848_v20, %v807_v6 }
 0x156   : > { %v831_v24 = vmul.f32 %v2536_v22, %v823_v21 }
 0x157   : > { %v2850_v23 = vpop.eup %2849 }
 0x158   : > { %v824_v25 = vmul.f32 %v2850_v23, %v808_v10  ;;  %v839_v28 = vadd.f32 %v2537_v26, %v831_v24 }
 0x15a   : > { %v832_v27 = vmul.f32 %v2536_v22, %v824_v25 }
 0x15c   : > { %v840_v29 = vadd.f32 %v2537_v26, %v832_v27 }
 0x15e   : > { %v841_v30 = vpack.c.bf16 %v840_v29, %v839_v28 }
 0x160   : > { %842 = vst.msk [vmem:[#allocation2] sm:$0xff] %vm797_vm0, %v841_v30 }
 0x161 PF: > { %v2851_v31 = vld [vmem:[%s3092_s4] sm:$0xff]   ;;  %v2945_v32 = vmov 0.0   ;;  %v2852_v33 = vld [vmem:[%s3092_s4 + $0x8] sm:$0xff]   ;;  %vm2946_vm1 = vmmov 0   ;;  %vm867_vm2 = vcmask 261120   ;;  %s3534_s29 = scalar_lea.vmem %s3494_s5, %s3082_s23  ;;  %vm913_vm3 = vcmask 785408   ;;  %s3536_s24 = scalar_lea.vmem %s3496_s7, %s3082_s23 }
 0x162   : > { %2647 = vmatprep.subr.bf16.mxu0 %v2945_v32  ;;  %2655 = vmatprep.subr.bf16.mxu1 %v2945_v32  ;;  %v2538_v35 = vld [vmem:[%s3534_s29] ss:$0 sm:$0xff]  ;;  %s2947_s30 = smov 120   ;;  %s2948_s1 = smov 96   ;;  %vm924_vm4 = vcmask 64512   ;;  %vm988_vm5 = vcmask 1043456  }
 0x163   : > { %2648 = vmatpush3.bf16.msra.mxu0 %v2851_v31  ;;  %2651 = vmatprep.mubr.msk.bf16.mxu0 %vm2946_vm1, %v2945_v32  ;;  %s2949_s16 = smov 80   ;;  %s2950_s6 = smov 88   ;;  %vm1381_vm6 = vcmask 195584   ;;  %vm1378_vm7 = vcmask 130048   ;;  %vm2096_vm8 = vcmask 523264  }
 0x164   : > { %2649 = vmatprep.subr.bf16.mxu0 %v2945_v32  ;;  %2657 = vmatprep.mubr.msk.bf16.mxu1 %vm2946_vm1, %v2945_v32  ;;  %s2951_s3 = smov 72   ;;  %s2952_s17 = smov 112  }
 0x165   : > { %s2953_s19 = smov 104   ;;  %s3535_s4 = sld [smem:[#allocation9_spill]] }
 0x166   : > { %p2578_p5 = scmp.ne.s32.totalorder %s3076_s22, 1 }
 0x167   : > { %v3165_v34 = vld [vmem:[#allocation2] sm:$0xff]  ;;  %2650 = vmatpush3.bf16.msra.mxu0 %v2852_v33  ;;  %s3540_s29 = sld [smem:[#allocation14_spill]] (!%p2578_p5)  ;;  %vm2962_vm9 = vmmov (!%p2578_p5), 0   ;;  %vm2196_vm10 = vcmask (!%p2578_p5), 1040384   ;;  %vm2367_vm11 = vcmask (!%p2578_p5), 17408  }
 0x168   : > { %2661 = vmatprep.subr.bf16.mxu0 %v2945_v32 }
 0x16a   : > { %2652 = vmatmul.mubr.msk.bf16.vlgmr.msra.gmra.mrb[0].mxu0 %vm867_vm2, %v3165_v34 }
 0x16b   : > { %2663 = vmatprep.mubr.msk.bf16.mxu0 %vm2946_vm1, %v2945_v32  ;;  %v2542_v4 = vld [vmem:[%s3535_s4] ss:$0 sm:$0xff]  ;;  %v2551_v29 = vld [vmem:[%s3535_s4 + $0x1] ss:$0 sm:$0xff] }
 0x23d   : > { %v905_v36 = vpop.f32.mrb[0].mxu0 }
 0x23e   : > { %v2653_v37 = vpop.f32.mrb[1].mxu0  ;;  %v906_v39 = vadd.f32 %v2538_v35, %v905_v36 }
 0x23f   : > { %v908_v38 = vpop.f32.mrb[2].mxu0 }
 0x240   : > { %v909_v40 = vadd.f32 %v2538_v35, %v908_v38  ;;  %v2654_v41 = vpop.f32.mrb[3].mxu0 }
 0x242   : > { %v912_v42 = vpack.c.bf16 %v909_v40, %v906_v39 }
 0x244   : > { %914 = vst.msk [vmem:[#allocation3] sm:$0xff] %vm913_vm3, %v912_v42 }
 0x24b   : > { %v3177_v43 = vld [vmem:[#allocation3] sm:$0xf]  ;;  %v1385_v44 = vld [vmem:[#allocation3] sm:$0xf0] }
 0x24c   : > { %1033 = vrot.lane.b32.xlu1 %v3177_v43, %s2947_s30  ;;  %922 = vrot.lane.b32.xlu0 %v3177_v43, %s2948_s1  ;;  %v3185_v45 = vrot.slane %v1385_v44, 4 }
 0x250   : > { %1146 = vrot.lane.b32.xlu1 %v3177_v43, %s2949_s16  ;;  %1035 = vrot.lane.b32.xlu0 %v3177_v43, %s2950_s6 }
 0x254   : > { %1257 = vrot.lane.b32.xlu1 %v3177_v43, %s2951_s3  ;;  %1144 = vrot.lane.b32.xlu0 %v3177_v43, %s2952_s17 }
 0x258   : > { %1392 = vrot.lane.b32.xlu1 %v3185_v45, %s2948_s1  ;;  %1255 = vrot.lane.b32.xlu0 %v3177_v43, %s2953_s19  ;;  %s2955_s1 = smov 64  }
 0x25c   : > { %1501 = vrot.lane.b32.xlu1 %v3185_v45, %s2947_s30  ;;  %1503 = vrot.lane.b32.xlu0 %v3185_v45, %s2950_s6  ;;  %s2954_s30 = smov 56   ;;  %s2957_s6 = smov 40  }
 0x260   : > { %1612 = vrot.lane.b32.xlu1 %v3185_v45, %s2952_s17  ;;  %1614 = vrot.lane.b32.xlu0 %v3185_v45, %s2949_s16  ;;  %s2956_s16 = smov 48   ;;  %s2959_s17 = smov 16  }
 0x264   : > { %1723 = vrot.lane.b32.xlu1 %v3185_v45, %s2953_s19  ;;  %1725 = vrot.lane.b32.xlu0 %v3185_v45, %s2951_s3  ;;  %s2958_s3 = smov 8   ;;  %s2960_s19 = smov 24  }
 0x2be   : > { %v923_v46 = vpop.permute.xlu0 %922  ;;  %v1034_v49 = vpop.permute.xlu1 %1033 }
 0x2bf   : > { %v929_v47 = vsel %vm924_vm4, %v923_v46, 0 }
 0x2c0   : > { %2656 = vmatpush3.bf16.xpose.msra.mxu1 %v929_v47 }
 0x2c1   : > { %2667 = vmatprep.subr.bf16.mxu1 %v2945_v32 }
 0x2c2   : > { %v1036_v48 = vpop.permute.xlu0 %1035  ;;  %v1147_v51 = vpop.permute.xlu1 %1146 }
 0x2c3   : > { %v1041_v50 = vsel %vm924_vm4, %v1036_v48, 0  ;;  %v1152_v52 = vsel %vm924_vm4, %v1147_v51, 0 }
 0x2c6   : > { %v1258_v53 = vpop.permute.xlu1 %1257  ;;  %v1145_v54 = vpop.permute.xlu0 %1144 }
 0x2c7   : > { %2658 = vmatmul.mubr.msk.bf16.vlgmr.msra.gmra.mrb[0].mxu1 %vm924_vm4, %v3177_v43  ;;  %v1263_v55 = vsel %vm924_vm4, %v1258_v53, 0 }
 0x2c8   : > { %2668 = vmatpush3.bf16.xpose.msra.mxu1 %v1041_v50  ;;  %2669 = vmatprep.mubr.msk.bf16.mxu1 %vm2946_vm1, %v2945_v32 }
 0x2c9   : > { %2679 = vmatprep.subr.bf16.mxu1 %v2945_v32 }
 0x2ca   : > { %v1393_v56 = vpop.permute.xlu1 %1392  ;;  %v1256_v57 = vpop.permute.xlu0 %1255 }
 0x2cb   : > { %v1398_v58 = vsel %vm924_vm4, %v1393_v56, 0 }
 0x2ce   : > { %v1504_v59 = vpop.permute.xlu0 %1503  ;;  %v1502_v62 = vpop.permute.xlu1 %1501 }
 0x2cf   : > { %2670 = vmatmul.mubr.msk.bf16.vlgmr.msra.gmra.mrb[4].mxu1 %vm924_vm4, %v1034_v49  ;;  %v1509_v60 = vsel %vm924_vm4, %v1504_v59, 0 }
 0x2d0   : > { %2680 = vmatpush3.bf16.xpose.msra.mxu1 %v1152_v52  ;;  %2681 = vmatprep.mubr.msk.bf16.mxu1 %vm2946_vm1, %v2945_v32 }
 0x2d1   : > { %2691 = vmatprep.subr.bf16.mxu1 %v2945_v32 }
 0x2d2   : > { %v1615_v61 = vpop.permute.xlu0 %1614  ;;  %v1613_v1 = vpop.permute.xlu1 %1612 }
 0x2d3   : > { %v1620_v63 = vsel %vm924_vm4, %v1615_v61, 0 }
 0x2d6   : > { %v1726_v0 = vpop.permute.xlu0 %1725  ;;  %v1724_v3 = vpop.permute.xlu1 %1723 }
 0x2d7   : > { %2682 = vmatmul.mubr.msk.bf16.vlgmr.msra.gmra.mrb[8].mxu1 %vm924_vm4, %v1145_v54  ;;  %v1731_v2 = vsel %vm924_vm4, %v1726_v0, 0 }
 0x2d8   : > { %2692 = vmatpush3.bf16.xpose.msra.mxu1 %v1263_v55  ;;  %2693 = vmatprep.mubr.msk.bf16.mxu1 %vm2946_vm1, %v2945_v32 }
 0x2d9   : > { %2703 = vmatprep.subr.bf16.mxu1 %v2945_v32 }
 0x2df   : > { %2694 = vmatmul.mubr.msk.bf16.vlgmr.msra.gmra.mrb[12].mxu1 %vm924_vm4, %v1256_v57 }
 0x2e0   : > { %2704 = vmatpush3.bf16.xpose.msra.mxu1 %v1398_v58  ;;  %2705 = vmatprep.mubr.msk.bf16.mxu1 %vm2946_vm1, %v2945_v32 }
 0x2e1   : > { %2715 = vmatprep.subr.bf16.mxu1 %v2945_v32 }
 0x2e7   : > { %2706 = vmatmul.mubr.msk.bf16.vlgmr.msra.gmra.mrb[16].mxu1 %vm924_vm4, %v3185_v45 }
 0x2e8   : > { %2716 = vmatpush3.bf16.xpose.msra.mxu1 %v1509_v60  ;;  %2717 = vmatprep.mubr.msk.bf16.mxu1 %vm2946_vm1, %v2945_v32 }
 0x2e9   : > { %2727 = vmatprep.subr.bf16.mxu1 %v2945_v32 }
 0x2ef   : > { %2718 = vmatmul.mubr.msk.bf16.vlgmr.msra.gmra.mrb[20].mxu1 %vm924_vm4, %v1502_v62 }
 0x2f0   : > { %2728 = vmatpush3.bf16.xpose.msra.mxu1 %v1620_v63  ;;  %2729 = vmatprep.mubr.msk.bf16.mxu1 %vm2946_vm1, %v2945_v32 }
 0x2f1   : > { %2739 = vmatprep.subr.bf16.mxu1 %v2945_v32 }
 0x2f7   : > { %2730 = vmatmul.mubr.msk.bf16.vlgmr.msra.gmra.mrb[24].mxu1 %vm924_vm4, %v1613_v1 }
 0x2f8   : > { %2740 = vmatpush3.bf16.xpose.msra.mxu1 %v1731_v2  ;;  %2741 = vmatprep.mubr.msk.bf16.mxu1 %vm2946_vm1, %v2945_v32 }
 0x2f9   : > { %2751 = vmatprep.subr.bf16.mxu1 %v2945_v32 }
 0x2ff   : > { %2742 = vmatmul.mubr.msk.bf16.vlgmr.msra.gmra.mrb[28].mxu1 %vm924_vm4, %v1724_v3 }
 0x300   : > { %2755 = vmatprep.mubr.msk.bf16.mxu1 %vm2946_vm1, %v2945_v32 }
 0x39a   : > { %v965_v5 = vpop.f32.mrb[0].mxu1 }
 0x39b   : > { %v966_v6 = vadd.f32 %v2542_v4, %v965_v5  ;;  %v2659_v7 = vpop.f32.mrb[1].mxu1 }
 0x39c   : > { %v968_v8 = vpop.f32.mrb[2].mxu1 }
 0x39d   : > { %v2660_v9 = vpop.f32.mrb[3].mxu1  ;;  %v971_v10 = vsel %vm924_vm4, %v966_v6, -inf }
 0x39e   : > { %972 = vmax.xlane.f32.xlu0 %v971_v10 }
 0x3a2   : > { %v1077_v11 = vpop.f32.mrb[4].mxu1 }
 0x3a3   : > { %v1078_v12 = vadd.f32 %v2542_v4, %v1077_v11  ;;  %v2671_v13 = vpop.f32.mrb[5].mxu1 }
 0x3a4   : > { %v1080_v14 = vpop.f32.mrb[6].mxu1 }
 0x3a5   : > { %v2672_v15 = vpop.f32.mrb[7].mxu1  ;;  %v1083_v16 = vsel %vm924_vm4, %v1078_v12, -inf }
 0x3a6   : > { %1084 = vmax.xlane.f32.xlu1 %v1083_v16 }
 0x3aa   : > { %v1188_v17 = vpop.f32.mrb[8].mxu1 }
 0x3ab   : > { %v1189_v18 = vadd.f32 %v2542_v4, %v1188_v17  ;;  %v2683_v19 = vpop.f32.mrb[9].mxu1 }
 0x3ac   : > { %v1191_v20 = vpop.f32.mrb[10].mxu1 }
 0x3ad   : > { %v2684_v21 = vpop.f32.mrb[11].mxu1  ;;  %v1194_v22 = vsel %vm924_vm4, %v1189_v18, -inf }
 0x3ae   : > { %1195 = vmax.xlane.f32.xlu0 %v1194_v22 }
 0x3b2   : > { %v1299_v23 = vpop.f32.mrb[12].mxu1 }
 0x3b3   : > { %v3243_v24 = vadd.f32 %v2542_v4, %v1299_v23  ;;  %v2695_v25 = vpop.f32.mrb[13].mxu1 }
 0x3b4   : > { %v1302_v26 = vpop.f32.mrb[14].mxu1 }
 0x3b5   : > { %v2696_v27 = vpop.f32.mrb[15].mxu1  ;;  %v1305_v28 = vsel %vm924_vm4, %v3243_v24, -inf }
 0x3b6   : > { %1306 = vmax.xlane.f32.xlu0 %v1305_v28 }
 0x3ba   : > { %v1434_v30 = vpop.f32.mrb[16].mxu1 }
 0x3bb   : > { %v3250_v31 = vadd.f32 %v2551_v29, %v1434_v30  ;;  %v2707_v33 = vpop.f32.mrb[17].mxu1 }
 0x3bc   : > { %v1437_v35 = vpop.f32.mrb[18].mxu1 }
 0x3bd   : > { %v2708_v36 = vpop.f32.mrb[19].mxu1  ;;  %v1440_v37 = vsel %vm924_vm4, %v3250_v31, -inf }
 0x3be   : > { %1441 = vmax.xlane.f32.xlu1 %v1440_v37 }
 0x3c2   : > { %v1545_v38 = vpop.f32.mrb[20].mxu1 }
 0x3c3   : > { %v3254_v39 = vadd.f32 %v2551_v29, %v1545_v38  ;;  %v2719_v40 = vpop.f32.mrb[21].mxu1 }
 0x3c4   : > { %v1548_v41 = vpop.f32.mrb[22].mxu1 }
 0x3c5   : > { %v2720_v42 = vpop.f32.mrb[23].mxu1  ;;  %v1551_v44 = vsel %vm924_vm4, %v3254_v39, -inf }
 0x3c6   : > { %1552 = vmax.xlane.f32.xlu0 %v1551_v44 }
 0x3ca   : > { %v1656_v46 = vpop.f32.mrb[24].mxu1 }
 0x3cb   : > { %v1657_v47 = vadd.f32 %v2551_v29, %v1656_v46  ;;  %v2731_v48 = vpop.f32.mrb[25].mxu1 }
 0x3cc   : > { %v1659_v49 = vpop.f32.mrb[26].mxu1 }
 0x3cd   : > { %v2732_v50 = vpop.f32.mrb[27].mxu1  ;;  %v1662_v51 = vsel %vm924_vm4, %v1657_v47, -inf }
 0x3ce   : > { %1663 = vmax.xlane.f32.xlu1 %v1662_v51 }
 0x3d2   : > { %v1767_v52 = vpop.f32.mrb[28].mxu1 }
 0x3d3   : > { %v2743_v53 = vpop.f32.mrb[29].mxu1  ;;  %v3263_v56 = vadd.f32 %v2551_v29, %v1767_v52 }
 0x3d4   : > { %v1770_v54 = vpop.f32.mrb[30].mxu1 }
 0x3d5   : > { %v2744_v55 = vpop.f32.mrb[31].mxu1  ;;  %v1773_v57 = vsel %vm924_vm4, %v3263_v56, -inf }
 0x3dc   : > { %1095 = vrot.lane.b32.xlu0 %v3177_v43, %s2954_s30 }
 0x3df   : > { %983 = vrot.lane.b32.xlu1 %v3177_v43, %s2955_s1 }
 0x3fb   : > { %1774 = vmax.xlane.f32.xlu0 %v1773_v57 }
 0x42b   : > { %v973_v58 = vpop.xlane.xlu0 %972 }
 0x42c   : > { %v974_v59 = vsub.f32 %v966_v6, %v973_v58 }
 0x42e   : > { %v975_v60 = vmul.f32 1.442695, %v974_v59 }
 0x430   : > { %2861 = vpow2.f32 %v975_v60 }
 0x433   : > { %v1085_v61 = vpop.xlane.xlu1 %1084 }
 0x434   : > { %v1086_v62 = vsub.f32 %v1078_v12, %v1085_v61 }
 0x436   : > { %v1087_v63 = vmul.f32 1.442695, %v1086_v62 }
 0x438   : > { %2863 = vpow2.f32 %v1087_v63 }
 0x43a   : > { %v3267_v0 = vpop.eup %2861 }
 0x43b   : > { %v1196_v1 = vpop.xlane.xlu0 %1195  ;;  %v977_v2 = vsel %vm924_vm4, %v3267_v0, 0.0 }
 0x43c   : > { %v1197_v3 = vsub.f32 %v1189_v18, %v1196_v1  ;;  %978 = vadd.xlane.f32.xlu1 %v977_v2 }
 0x43e   : > { %v1198_v4 = vmul.f32 1.442695, %v1197_v3 }
 0x440   : > { %2865 = vpow2.f32 %v1198_v4 }
 0x442   : > { %v3271_v5 = vpop.eup %2863 }
 0x443   : > { %v1089_v6 = vsel %vm924_vm4, %v3271_v5, 0.0  ;;  %v1307_v12 = vpop.xlane.xlu0 %1306 }
 0x444   : > { %1090 = vadd.xlane.f32.xlu0 %v1089_v6  ;;  %v1308_v14 = vsub.f32 %v3243_v24, %v1307_v12 }
 0x446   : > { %v1309_v15 = vmul.f32 1.442695, %v1308_v14 }
 0x448   : > { %2867 = vpow2.f32 %v1309_v15 }
 0x44a   : > { %v3275_v7 = vpop.eup %2865 }
 0x44b   : > { %v1200_v8 = vsel %vm924_vm4, %v3275_v7, 0.0  ;;  %v1442_v9 = vpop.xlane.xlu1 %1441 }
 0x44c   : > { %1201 = vadd.xlane.f32.xlu1 %v1200_v8  ;;  %v1443_v16 = vsub.f32 %v3250_v31, %v1442_v9 }
 0x44e   : > { %v1444_v19 = vmul.f32 1.442695, %v1443_v16 }
 0x450   : > { %2869 = vpow2.f32 %v1444_v19 }
 0x452   : > { %v2868_v22 = vpop.eup %2867 }
 0x453   : > { %v1553_v17 = vpop.xlane.xlu0 %1552  ;;  %v1311_v23 = vsel %vm924_vm4, %v2868_v22, 0.0 }
 0x454   : > { %v1554_v18 = vsub.f32 %v3254_v39, %v1553_v17 }
 0x457   : > { %v1096_v30 = vpop.permute.xlu0 %1095 }
 0x458   : > { %v1101_v44 = vsel %vm988_vm5, %v1096_v30, 0 }
 0x45a   : > { %1206 = vrot.lane.b32.xlu0 %v3177_v43, %s2956_s16  ;;  %v3289_v25 = vpop.eup %2869 }
 0x45b   : > { %v1664_v10 = vpop.xlane.xlu1 %1663  ;;  %v1446_v26 = vsel %vm924_vm4, %v3289_v25, 0.0 }
 0x45c   : > { %v1665_v20 = vsub.f32 %v1657_v47, %v1664_v10 }
 0x45d   : > { %1317 = vrot.lane.b32.xlu1 %v3177_v43, %s2957_s6  ;;  %v1555_v43 = vmul.f32 1.442695, %v1554_v18 }
 0x45e   : > { %v1666_v21 = vmul.f32 1.442695, %v1665_v20 }
 0x45f   : > { %v984_v11 = vpop.permute.xlu1 %983  ;;  %2871 = vpow2.f32 %v1555_v43 }
 0x460   : > { %v990_v13 = vsel %vm988_vm5, %v984_v11, 0  ;;  %2873 = vpow2.f32 %v1666_v21 }
 0x461   : > { %2662 = vmatpush3.bf16.msra.mxu0 %v990_v13 }
 0x462   : > { %2673 = vmatprep.subr.bf16.mxu0 %v2945_v32 }
 0x469   : > { %v3291_v24 = vpop.eup %2871 }
 0x46a   : > { %v3295_v27 = vpop.eup %2873  ;;  %v1557_v29 = vsel %vm924_vm4, %v3291_v24, 0.0 }
 0x46b   : > { %v1668_v28 = vsel %vm924_vm4, %v3295_v27, 0.0 }
 0x479   : > { %1312 = vadd.xlane.f32.xlu0 %v1311_v23 }
 0x47d   : > { %1447 = vadd.xlane.f32.xlu0 %v1446_v26 }
 0x481   : > { %1669 = vadd.xlane.f32.xlu0 %v1668_v28  ;;  %1558 = vadd.xlane.f32.xlu1 %v1557_v29 }
 0x488   : > { %v1775_v31 = vpop.xlane.xlu0 %1774 }
 0x489   : > { %v1776_v33 = vsub.f32 %v3263_v56, %v1775_v31 }
 0x48b   : > { %v1777_v35 = vmul.f32 1.442695, %v1776_v33 }
 0x48d   : > { %2875 = vpow2.f32 %v1777_v35 }
 0x492   : > { %1563 = vrot.lane.b32.xlu1 %v3185_v45, %s2954_s30 }
 0x496   : > { %1674 = vrot.lane.b32.xlu1 %v3185_v45, %s2956_s16  ;;  %s3538_s16 = scalar_lea.vmem %s3498_s9, %s3082_s23 }
 0x497   : > { %v3306_v36 = vpop.eup %2875 }
 0x498   : > { %v1779_v37 = vsel %vm924_vm4, %v3306_v36, 0.0 }
 0x499   : > { %1780 = vadd.xlane.f32.xlu0 %v1779_v37 }
 0x49a   : > { %1785 = vrot.lane.b32.xlu1 %v3185_v45, %s2957_s6 }
 0x4af   : > { %1452 = vrot.lane.b32.xlu0 %v3185_v45, %s2955_s1 }
 0x4c9   : > { %v979_v38 = vpop.xlane.xlu1 %978 }
 0x4ca   : > { %2877 = vrcp.f32 %v979_v38 }
 0x4d1   : > { %v1091_v39 = vpop.xlane.xlu0 %1090 }
 0x4d2   : > { %2879 = vrcp.f32 %v1091_v39 }
 0x4d4   : > { %v2878_v40 = vpop.eup %2877 }
 0x4d5   : > { %v981_v41 = vmul.f32 %v2878_v40, %v3267_v0  ;;  %v1207_v48 = vpop.permute.xlu0 %1206 }
 0x4d6   : > { %v1212_v50 = vsel %vm988_vm5, %v1207_v48, 0 }
 0x4d7   : > { %v982_v42 = vpack.c.bf16 %v981_v41, %v981_v41 }
 0x4d9   : > { %2664 = vmatmul.mubr.msk.bf16.vlgmr.msra.gmra.mrb[4].mxu0 %vm924_vm4, %v982_v42  ;;  %v1202_v46 = vpop.xlane.xlu1 %1201 }
 0x4da   : > { %2881 = vrcp.f32 %v1202_v46  ;;  %2674 = vmatpush3.bf16.msra.mxu0 %v1101_v44  ;;  %2675 = vmatprep.mubr.msk.bf16.mxu0 %vm2946_vm1, %v2945_v32  ;;  %v2853_v44 = vld [vmem:[%s3097_s0] sm:$0xff]  }
 0x4db   : > { %2685 = vmatprep.subr.bf16.mxu0 %v2945_v32  ;;  %2752 = vmatpush3.bf16.msra.mxu1 %v2853_v44 }
 0x4dc   : > { %v2880_v45 = vpop.eup %2879  ;;  %2753 = vmatprep.subr.bf16.mxu1 %v2945_v32 }
 0x4dd   : > { %v1093_v47 = vmul.f32 %v2880_v45, %v3271_v5  ;;  %v1318_v53 = vpop.permute.xlu1 %1317 }
 0x4de   : > { %v1323_v55 = vsel %vm988_vm5, %v1318_v53, 0 }
 0x4df   : > { %v1094_v49 = vpack.c.bf16 %v1093_v47, %v1093_v47 }
 0x4e1   : > { %2676 = vmatmul.mubr.msk.bf16.vlgmr.msra.gmra.mrb[8].mxu0 %vm924_vm4, %v1094_v49 }
 0x4e2   : > { %2686 = vmatpush3.bf16.msra.mxu0 %v1212_v50  ;;  %2687 = vmatprep.mubr.msk.bf16.mxu0 %vm2946_vm1, %v2945_v32  ;;  %v2854_v50 = vld [vmem:[%s3097_s0 + $0x8] sm:$0xff]  }
 0x4e3   : > { %2697 = vmatprep.subr.bf16.mxu0 %v2945_v32  ;;  %2754 = vmatpush3.bf16.msra.mxu1 %v2854_v50 }
 0x4e4   : > { %v2882_v51 = vpop.eup %2881  ;;  %2767 = vmatprep.subr.bf16.mxu1 %v2945_v32 }
 0x4e5   : > { %v1204_v52 = vmul.f32 %v2882_v51, %v3275_v7 }
 0x4e7   : > { %v1205_v54 = vpack.c.bf16 %v1204_v52, %v1204_v52 }
 0x4e9   : > { %2688 = vmatmul.mubr.msk.bf16.vlgmr.msra.gmra.mrb[12].mxu0 %vm924_vm4, %v1205_v54 }
 0x4ea   : > { %2698 = vmatpush3.bf16.msra.mxu0 %v1323_v55  ;;  %2699 = vmatprep.mubr.msk.bf16.mxu0 %vm2946_vm1, %v2945_v32 }
 0x4eb   : > { %2709 = vmatprep.subr.bf16.mxu0 %v2945_v32 }
 0x506   : > { %v1313_v56 = vpop.xlane.xlu0 %1312 }
 0x507   : > { %2883 = vrcp.f32 %v1313_v56 }
 0x50a   : > { %v1448_v60 = vpop.xlane.xlu0 %1447 }
 0x50b   : > { %2885 = vrcp.f32 %v1448_v60 }
 0x50e   : > { %v1559_v61 = vpop.xlane.xlu1 %1558  ;;  %v1670_v62 = vpop.xlane.xlu0 %1669 }
 0x50f   : > { %2887 = vrcp.f32 %v1559_v61 }
 0x510   : > { %2889 = vrcp.f32 %v1670_v62 }
 0x511   : > { %v2884_v57 = vpop.eup %2883 }
 0x512   : > { %v1315_v58 = vmul.f32 %v2884_v57, %v2868_v22  ;;  %v1564_v4 = vpop.permute.xlu1 %1563 }
 0x513   : > { %v1569_v7 = vsel %vm988_vm5, %v1564_v4, 0 }
 0x514   : > { %v1316_v59 = vpack.c.bf16 %v1315_v58, %v1315_v58 }
 0x515   : > { %v2886_v63 = vpop.eup %2885 }
 0x516   : > { %2700 = vmatmul.mubr.msk.bf16.vlgmr.msra.gmra.mrb[16].mxu0 %vm924_vm4, %v1316_v59  ;;  %v1450_v1 = vmul.f32 %v2886_v63, %v3289_v25  ;;  %v1675_v9 = vpop.permute.xlu1 %1674 }
 0x517   : > { %2711 = vmatprep.mubr.msk.bf16.mxu0 %vm2946_vm1, %v2945_v32  ;;  %v1680_v12 = vsel %vm988_vm5, %v1675_v9, 0 }
 0x518   : > { %v1451_v5 = vpack.c.bf16 %v1450_v1, %v1450_v1 }
 0x519   : > { %v2888_v6 = vpop.eup %2887 }
 0x51a   : > { %v1561_v8 = vmul.f32 %v2888_v6, %v3291_v24  ;;  %v2890_v11 = vpop.eup %2889  ;;  %v1786_v14 = vpop.permute.xlu1 %1785 }
 0x51b   : > { %v1672_v13 = vmul.f32 %v2890_v11, %v3295_v27  ;;  %v1791_v17 = vsel %vm988_vm5, %v1786_v14, 0  ;;  %v2560_v14 = vld [vmem:[%s3536_s24] ss:$0 sm:$0xff] }
 0x51c   : > { %v1562_v10 = vpack.c.bf16 %v1561_v8, %v1561_v8 }
 0x51d   : > { %v1673_v15 = vpack.c.bf16 %v1672_v13, %v1672_v13 }
 0x526   : > { %v1781_v0 = vpop.xlane.xlu0 %1780 }
 0x527   : > { %2891 = vrcp.f32 %v1781_v0 }
 0x52a   : > { %v1453_v2 = vpop.permute.xlu0 %1452 }
 0x52b   : > { %v1458_v3 = vsel %vm988_vm5, %v1453_v2, 0 }
 0x52c   : > { %2710 = vmatpush3.bf16.msra.mxu0 %v1458_v3 }
 0x52d   : > { %2721 = vmatprep.subr.bf16.mxu0 %v2945_v32 }
 0x52f   : > { %2712 = vmatmul.mubr.msk.bf16.vlgmr.msra.gmra.mrb[20].mxu0 %vm924_vm4, %v1451_v5 }
 0x530   : > { %2722 = vmatpush3.bf16.msra.mxu0 %v1569_v7  ;;  %2723 = vmatprep.mubr.msk.bf16.mxu0 %vm2946_vm1, %v2945_v32 }
 0x531   : > { %2733 = vmatprep.subr.bf16.mxu0 %v2945_v32  ;;  %v2892_v16 = vpop.eup %2891 }
 0x532   : > { %v1783_v18 = vmul.f32 %v2892_v16, %v3306_v36 }
 0x534   : > { %v1784_v19 = vpack.c.bf16 %v1783_v18, %v1783_v18 }
 0x537   : > { %2724 = vmatmul.mubr.msk.bf16.vlgmr.msra.gmra.mrb[24].mxu0 %vm924_vm4, %v1562_v10 }
 0x538   : > { %2734 = vmatpush3.bf16.msra.mxu0 %v1680_v12  ;;  %2735 = vmatprep.mubr.msk.bf16.mxu0 %vm2946_vm1, %v2945_v32 }
 0x539   : > { %2745 = vmatprep.subr.bf16.mxu0 %v2945_v32 }
 0x53f   : > { %2736 = vmatmul.mubr.msk.bf16.vlgmr.msra.gmra.mrb[28].mxu0 %vm924_vm4, %v1673_v15  ;;  %v1921_v15 = vunpack.c.l.bf16 %v3165_v34 }
 0x540   : > { %2746 = vmatpush3.bf16.msra.mxu0 %v1791_v17  ;;  %2747 = vmatprep.mubr.msk.bf16.mxu0 %vm2946_vm1, %v2945_v32 }
 0x541   : > { %2759 = vmatprep.subr.bf16.mxu0 %v2945_v32 }
 0x547   : > { %2748 = vmatmul.mubr.msk.bf16.vlgmr.msra.gmra.mrb[32].mxu0 %vm924_vm4, %v1784_v19  ;;  %v1922_v19 = vunpack.c.h.bf16 %v3165_v34 }
 0x548   : > { %2763 = vmatprep.mubr.msk.bf16.mxu0 %vm2946_vm1, %v2945_v32 }
 0x5ac   : > { %v3359_v20 = vpop.f32.mrb[4].mxu0 }
 0x5ad   : > { %v2665_v43 = vpop.f32.mrb[5].mxu0  ;;  %v1032_v5 = vpack.c.bf16 %v3359_v20, %v3359_v20 }
 0x5ae   : > { %v1029_v21 = vpop.f32.mrb[6].mxu0 }
 0x5af   : > { %v2666_v22 = vpop.f32.mrb[7].mxu0 }
 0x5b4   : > { %v1137_v23 = vpop.f32.mrb[8].mxu0 }
 0x5b5   : > { %v1143_v25 = vpack.c.bf16 %v1137_v23, %v1137_v23  ;;  %v2677_v24 = vpop.f32.mrb[9].mxu0 }
 0x5b6   : > { %v1140_v26 = vpop.f32.mrb[10].mxu0 }
 0x5b7   : > { %1367 = vrot.lane.b32.xlu0 %v1143_v25, %s2958_s3  ;;  %v2678_v27 = vpop.f32.mrb[11].mxu0 }
 0x5bc   : > { %v1248_v28 = vpop.f32.mrb[12].mxu0 }
 0x5bd   : > { %v1254_v29 = vpack.c.bf16 %v1248_v28, %v1248_v28  ;;  %v2689_v30 = vpop.f32.mrb[13].mxu0 }
 0x5be   : > { %v1251_v31 = vpop.f32.mrb[14].mxu0 }
 0x5bf   : > { %1370 = vrot.lane.b32.xlu0 %v1254_v29, %s2959_s17  ;;  %v2690_v33 = vpop.f32.mrb[15].mxu0 }
 0x5e9   : > { %v1359_v35 = vpop.f32.mrb[16].mxu0 }
 0x5ea   : > { %v2701_v36 = vpop.f32.mrb[17].mxu0  ;;  %v1365_v61 = vpack.c.bf16 %v1359_v35, %v1359_v35 }
 0x5eb   : > { %v1362_v37 = vpop.f32.mrb[18].mxu0 }
 0x5ec   : > { %v2702_v38 = vpop.f32.mrb[19].mxu0  ;;  %v2855_v37 = vld [vmem:[%s3114_s28] sm:$0xff]  }
 0x5ed   : > { %2760 = vmatpush3.bf16.msra.mxu0 %v2855_v37  ;;  %v2856_v38 = vld [vmem:[%s3114_s28 + $0x8] sm:$0xff]   ;;  %s3537_s28 = scalar_lea.vmem %s3497_s8, %s3082_s23 }
 0x5ee   : > { %2761 = vmatprep.subr.bf16.mxu0 %v2945_v32 }
 0x5f1   : > { %2762 = vmatpush3.bf16.msra.mxu0 %v2856_v38 }
 0x602   : > { %v1494_v39 = vpop.f32.mrb[20].mxu0 }
 0x603   : > { %v2713_v40 = vpop.f32.mrb[21].mxu0  ;;  %v1500_v0 = vpack.c.bf16 %v1494_v39, %v1494_v39 }
 0x604   : > { %v1497_v41 = vpop.f32.mrb[22].mxu0 }
 0x605   : > { %v2714_v42 = vpop.f32.mrb[23].mxu0 }
 0x60a   : > { %v1605_v46 = vpop.f32.mrb[24].mxu0 }
 0x60b   : > { %v1611_v45 = vpack.c.bf16 %v1605_v46, %v1605_v46  ;;  %v2725_v47 = vpop.f32.mrb[25].mxu0 }
 0x60c   : > { %v1608_v48 = vpop.f32.mrb[26].mxu0 }
 0x60d   : > { %1835 = vrot.lane.b32.xlu1 %v1611_v45, %s2958_s3  ;;  %v2726_v49 = vpop.f32.mrb[27].mxu0  ;;  %v2564_v48 = vld [vmem:[%s3537_s28] ss:$0 sm:$0xff]  ;;  %s3542_s28 = sld [smem:[#allocation15_spill]] (!%p2578_p5) }
 0x612   : > { %v1716_v51 = vpop.f32.mrb[28].mxu0 }
 0x613   : > { %v1722_v52 = vpack.c.bf16 %v1716_v51, %v1716_v51  ;;  %v2737_v53 = vpop.f32.mrb[29].mxu0 }
 0x614   : > { %v1719_v54 = vpop.f32.mrb[30].mxu0 }
 0x615   : > { %1838 = vrot.lane.b32.xlu1 %v1722_v52, %s2959_s17  ;;  %v2738_v55 = vpop.f32.mrb[31].mxu0  ;;  %v2565_v52 = vld [vmem:[%s3538_s16] ss:$0 sm:$0xff]  ;;  %s3539_s17 = scalar_lea.vmem %s3500_s11, %s3082_s23  ;;  %s3543_s23 = sld [smem:[#allocation17_spill]] (!%p2578_p5) }
 0x61a   : > { %v1827_v56 = vpop.f32.mrb[32].mxu0 }
 0x61b   : > { %v1833_v57 = vpack.c.bf16 %v1827_v56, %v1827_v56  ;;  %v2749_v58 = vpop.f32.mrb[33].mxu0 }
 0x61c   : > { %v1830_v59 = vpop.f32.mrb[34].mxu0  ;;  %v2858_v58 = vld [vmem:[%s3124_s20 + $0x8] sm:$0xff]  }
 0x61d   : > { %1841 = vrot.lane.b32.xlu1 %v1833_v57, %s2960_s19  ;;  %v2750_v60 = vpop.f32.mrb[35].mxu0  ;;  %v2857_v57 = vld [vmem:[%s3124_s20] sm:$0xff]   ;;  %v2859_v59 = vld [vmem:[%s3124_s20 + $0x10] sm:$0xff]  }
 0x61e   : > { %v2860_v60 = vld [vmem:[%s3124_s20 + $0x18] sm:$0xff]  }
 0x621   : > { %1373 = vrot.lane.b32.xlu1 %v1365_v61, %s2960_s19  ;;  %v2566_v61 = vld [vmem:[%s3539_s17] ss:$0 sm:$0xff]  ;;  %s3541_s17 = sld [smem:[#allocation16_spill]] (!%p2578_p5) }
 0x629   : > { %v1368_v1 = vpop.permute.xlu0 %1367 }
 0x62a   : > { %v1377_v8 = vsel %vm924_vm4, %v1032_v5, %v1368_v1 }
 0x631   : > { %v1371_v6 = vpop.permute.xlu0 %1370 }
 0x632   : > { %v1380_v9 = vsel %vm1378_vm7, %v1377_v8, %v1371_v6 }
 0x67f   : > { %v1836_v62 = vpop.permute.xlu1 %1835 }
 0x680   : > { %v1845_v2 = vsel %vm924_vm4, %v1500_v0, %v1836_v62 }
 0x687   : > { %v1839_v63 = vpop.permute.xlu1 %1838 }
 0x688   : > { %v1847_v3 = vsel %vm1378_vm7, %v1845_v2, %v1839_v63 }
 0x68f   : > { %v1842_v4 = vpop.permute.xlu1 %1841 }
 0x690   : > { %v1849_v7 = vsel %vm1381_vm6, %v1847_v3, %v1842_v4 }
 0x691   : > { %v1851_v10 = vrot.slane %v1849_v7, 4 }
 0x693   : > { %v1374_v11 = vpop.permute.xlu1 %1373 }
 0x694   : > { %v1383_v12 = vsel %vm1381_vm6, %v1380_v9, %v1374_v11 }
 0x695   : > { %v1853_v13 = vsel %vm988_vm5, %v1383_v12, %v1851_v10 }
 0x696   : > { %2756 = vmatmul.mubr.msk.bf16.vlgmr.msra.gmra.mrb[32].mxu1 %vm867_vm2, %v1853_v13 }
 0x697   : > { %2775 = vmatprep.mubr.msk.bf16.mxu1 %vm2946_vm1, %v2945_v32  ;;  %2768 = vmatpush3.bf16.msra.mxu1 %v2857_v57 }
 0x698   : > { %2769 = vmatprep.subr.bf16.mxu1 %v2945_v32 }
 0x69b   : > { %2770 = vmatpush3.bf16.msra.mxu1 %v2858_v58 }
 0x69c   : > { %2771 = vmatprep.subr.bf16.mxu1 %v2945_v32 }
 0x69f   : > { %2772 = vmatpush3.bf16.msra.mxu1 %v2859_v59 }
 0x6a0   : > { %2773 = vmatprep.subr.bf16.mxu1 %v2945_v32 }
 0x6a3   : > { %2774 = vmatpush3.bf16.msra.mxu1 %v2860_v60 }
 0x769   : > { %v1913_v16 = vpop.f32.mrb[32].mxu1 }
 0x76a   : > { %v1914_v17 = vadd.f32 %v2560_v14, %v1913_v16  ;;  %v2757_v18 = vpop.f32.mrb[33].mxu1 }
 0x76b   : > { %v1916_v20 = vpop.f32.mrb[34].mxu1 }
 0x76c   : > { %v1917_v43 = vadd.f32 %v2560_v14, %v1916_v20  ;;  %v2758_v21 = vpop.f32.mrb[35].mxu1  ;;  %v1923_v22 = vadd.f32 %v1921_v15, %v1914_v17 }
 0x76d   : > { %v2570_v21 = vld [vmem:[%s781_s2] ss:$0 sm:$0xff] }
 0x76e   : > { %v1927_v23 = vsel %vm867_vm2, %v1923_v22, 0.0  ;;  %v1924_v25 = vadd.f32 %v1922_v19, %v1917_v43 }
 0x76f   : > { %1928 = vadd.xlane.f32.xlu0 %v1927_v23 }
 0x770   : > { %v1930_v24 = vsel %vm867_vm2, %v1924_v25, 0.0 }
 0x771   : > { %1931 = vadd.xlane.f32.xlu1 %v1930_v24 }
 0x7fc   : > { %v1929_v26 = vpop.xlane.xlu0 %1928 }
 0x7fd   : > { %v1934_v27 = vmul.f32 0.03125, %v1929_v26 }
 0x7fe   : > { %v1932_v28 = vpop.xlane.xlu1 %1931 }
 0x7ff   : > { %v1936_v29 = vsub.f32 %v1923_v22, %v1934_v27  ;;  %v1935_v30 = vmul.f32 0.03125, %v1932_v28 }
 0x801   : > { %v1937_v31 = vsub.f32 %v1924_v25, %v1935_v30  ;;  %v1938_v34 = vmul.f32 %v1936_v29, %v1936_v29 }
 0x803   : > { %v1940_v33 = vsel %vm867_vm2, %v1938_v34, 0.0  ;;  %v1939_v35 = vmul.f32 %v1937_v31, %v1937_v31 }
 0x804   : > { %1941 = vadd.xlane.f32.xlu0 %v1940_v33 }
 0x805   : > { %v1943_v36 = vsel %vm867_vm2, %v1939_v35, 0.0 }
 0x808   : > { %1944 = vadd.xlane.f32.xlu0 %v1943_v36 }
 0x891   : > { %v1942_v39 = vpop.xlane.xlu0 %1941 }
 0x892   : > { %v1946_v40 = vmul.f32 0.03125, %v1942_v39 }
 0x894   : > { %v1948_v41 = vadd.f32 1e-12, %v1946_v40 }
 0x895   : > { %v1945_v42 = vpop.xlane.xlu0 %1944 }
 0x896   : > { %2893 = vrsqrt.f32 %v1948_v41  ;;  %v1947_v44 = vmul.f32 0.03125, %v1945_v42 }
 0x898   : > { %v1949_v46 = vadd.f32 1e-12, %v1947_v44 }
 0x89a   : > { %2895 = vrsqrt.f32 %v1949_v46 }
 0x8a0   : > { %v2894_v45 = vpop.eup %2893 }
 0x8a1   : > { %v1952_v47 = vmul.f32 %v2894_v45, %v1936_v29 }
 0x8a3   : > { %v1960_v50 = vmul.f32 %v2564_v48, %v1952_v47 }
 0x8a4   : > { %v2896_v49 = vpop.eup %2895 }
 0x8a5   : > { %v1953_v51 = vmul.f32 %v2896_v49, %v1937_v31  ;;  %v1968_v54 = vadd.f32 %v2565_v52, %v1960_v50 }
 0x8a7   : > { %v1961_v53 = vmul.f32 %v2564_v48, %v1953_v51  ;;  %v2576_v51 = vld [vmem:[%s784_s26] ss:$0 sm:$0xff] }
 0x8a9   : > { %v1969_v55 = vadd.f32 %v2565_v52, %v1961_v53 }
 0x8ab   : > { %v1970_v56 = vpack.c.bf16 %v1969_v55, %v1968_v54 }
 0x8ad   : > { %2764 = vmatmul.mubr.msk.bf16.vlgmr.msra.gmra.mrb[36].mxu0 %vm867_vm2, %v1970_v56  ;;  %v2577_v56 = vld [vmem:[%s787_s18] ss:$0 sm:$0xff] }
 0x980   : > { %v2031_v62 = vpop.f32.mrb[36].mxu0 }
 0x981   : > { %v2032_v63 = vadd.f32 %v2566_v61, %v2031_v62  ;;  %v2765_v0 = vpop.f32.mrb[37].mxu0  ;;  %v2199_v62 = vld [vmem:[%s3540_s29 + $0x8] sm:$0xff] (!%p2578_p5) }
 0x982   : > { %v2034_v1 = vpop.f32.mrb[38].mxu0  ;;  %v2961_v0 = vmov (!%p2578_p5), 0.0|0.0  }
 0x983   : > { %v2038_v2 = vmul.f32 %v2032_v63, %v2032_v63  ;;  %v2035_v3 = vadd.f32 %v2566_v61, %v2034_v1  ;;  %v2766_v4 = vpop.f32.mrb[39].mxu0  ;;  %v2198_v61 = vld [vmem:[%s3540_s29] sm:$0xff] (!%p2578_p5)  ;;  %2801 = vmatprep.subr.bf16.mxu0 (!%p2578_p5), %v2961_v0  ;;  %2807 = vmatprep.subr.bf16.mxu1 (!%p2578_p5), %v2961_v0 }
 0x984   : > { %v2802_v1 = vpack.c.bf16 (!%p2578_p5), %v2199_v62, %v2198_v61 }
 0x985   : > { %v2040_v5 = vmul.f32 %v2038_v2, %v2032_v63  ;;  %v2039_v6 = vmul.f32 %v2035_v3, %v2035_v3  ;;  %v2201_v2 = vld [vmem:[%s3540_s29 + $0x18] sm:$0xff] (!%p2578_p5) }
 0x986   : > { %2803 = vmatpush3.bf16.msra.mxu0 (!%p2578_p5), %v2802_v1 }
 0x987   : > { %v2042_v7 = vmul.f32 0.044715, %v2040_v5  ;;  %v2041_v8 = vmul.f32 %v2039_v6, %v2035_v3  ;;  %2804 = vmatprep.subr.bf16.mxu0 (!%p2578_p5), %v2961_v0 }
 0x989   : > { %v2044_v9 = vadd.f32 %v2042_v7, %v2032_v63  ;;  %v2043_v32 = vmul.f32 0.044715, %v2041_v8  ;;  %v2283_v7 = vld [vmem:[%s3541_s17] sm:$0xff] (!%p2578_p5)  ;;  %v2284_v8 = vld [vmem:[%s3541_s17 + $0x8] sm:$0xff] (!%p2578_p5) }
 0x98b   : > { %v2046_v10 = vmul.f32 0.7978846, %v2044_v9  ;;  %v2045_v11 = vadd.f32 %v2043_v32, %v2035_v3  ;;  %v2285_v9 = vld [vmem:[%s3541_s17 + $0x10] sm:$0xff] (!%p2578_p5)  ;;  %v2808_v32 = vpack.c.bf16 (!%p2578_p5), %v2284_v8, %v2283_v7 }
 0x98d   : > { %2897 = vtanh.f32 %v2046_v10  ;;  %v2047_v12 = vmul.f32 0.7978846, %v2045_v11  ;;  %v2286_v10 = vld [vmem:[%s3541_s17 + $0x18] sm:$0xff] (!%p2578_p5) }
 0x98e   : > { %v2811_v11 = vpack.c.bf16 (!%p2578_p5), %v2286_v10, %v2285_v9 }
 0x98f   : > { %2899 = vtanh.f32 %v2047_v12  ;;  %v2579_v12 = vld [vmem:[%s3542_s28] ss:$0 sm:$0xff] (!%p2578_p5) }
 0x997   : > { %v2898_v13 = vpop.eup %2897 }
 0x998   : > { %v2050_v14 = vadd.f32 1.0, %v2898_v13 }
 0x999   : > { %v2900_v15 = vpop.eup %2899 }
 0x99a   : > { %v2052_v16 = vmul.f32 0.5, %v2050_v14  ;;  %v2051_v17 = vadd.f32 1.0, %v2900_v15 }
 0x99c   : > { %v2053_v18 = vmul.f32 0.5, %v2051_v17  ;;  %v2054_v19 = vmul.f32 %v2052_v16, %v2032_v63  ;;  %v2200_v63 = vld [vmem:[%s3540_s29 + $0x10] sm:$0xff] (!%p2578_p5)  ;;  %v2581_v17 = vld [vmem:[%s3543_s23] ss:$0 sm:$0xff] (!%p2578_p5) }
 0x99d   : > { %v2805_v4 = vpack.c.bf16 (!%p2578_p5), %v2201_v2, %v2200_v63 }
 0x99e   : > { %v2055_v20 = vmul.f32 %v2053_v18, %v2035_v3  ;;  %v2963_v3 = vmov (!%p2578_p5), 0.0  }
 0x99f   : > { %2787 = vmatprep.mubr.msk.f32.mxu0 (!%p2578_p5), %vm2962_vm9, %v2963_v3  ;;  %2806 = vmatpush3.bf16.msra.mxu0 (!%p2578_p5), %v2805_v4 }
 0x9a0   : > { %v2056_v43 = vpack.c.bf16 %v2055_v20, %v2054_v19 }
 0x9a2   : > { %2776 = vmatmul.mubr.msk.bf16.vlgmr.msra.gmra.mrb[36].mxu1 %vm2096_vm8, %v2056_v43 }
 0x9a3   : > { %2798 = vmatprep.mubr.msk.f32.mxu1 (!%p2578_p5), %vm2962_vm9, %v2963_v3  ;;  %2809 = vmatpush3.bf16.msra.mxu1 (!%p2578_p5), %v2808_v32 }
 0x9a4   : > { %2810 = vmatprep.subr.bf16.mxu1 (!%p2578_p5), %v2961_v0 }
 0x9a7   : > { %2812 = vmatpush3.bf16.msra.mxu1 (!%p2578_p5), %v2811_v11 }
 0xa75   : > { %v2134_v22 = vpop.f32.mrb[36].mxu1 }
 0xa76   : > { %v2135_v23 = vadd.f32 %v2570_v21, %v2134_v22  ;;  %v2777_v25 = vpop.f32.mrb[37].mxu1 }
 0xa77   : > { %v2137_v24 = vpop.f32.mrb[38].mxu1 }
 0xa78   : > { %v2138_v26 = vadd.f32 %v2570_v21, %v2137_v24  ;;  %v2778_v27 = vpop.f32.mrb[39].mxu1  ;;  %v2141_v28 = vadd.f32 %v2135_v23, %v1968_v54 }
 0xa7a   : > { %v2145_v29 = vsel %vm867_vm2, %v2141_v28, 0.0  ;;  %v2142_v30 = vadd.f32 %v2138_v26, %v1969_v55 }
 0xa7b   : > { %2146 = vadd.xlane.f32.xlu1 %v2145_v29 }
 0xa7c   : > { %v2148_v31 = vsel %vm867_vm2, %v2142_v30, 0.0 }
 0xa7d   : > { %2149 = vadd.xlane.f32.xlu0 %v2148_v31 }
 0xb08   : > { %v2147_v34 = vpop.xlane.xlu1 %2146 }
 0xb09   : > { %v2151_v33 = vmul.f32 0.03125, %v2147_v34 }
 0xb0a   : > { %v2150_v35 = vpop.xlane.xlu0 %2149 }
 0xb0b   : > { %v2153_v36 = vsub.f32 %v2141_v28, %v2151_v33  ;;  %v2152_v37 = vmul.f32 0.03125, %v2150_v35 }
 0xb0d   : > { %v2154_v38 = vsub.f32 %v2142_v30, %v2152_v37  ;;  %v2155_v39 = vmul.f32 %v2153_v36, %v2153_v36 }
 0xb0f   : > { %v2157_v40 = vsel %vm867_vm2, %v2155_v39, 0.0  ;;  %v2156_v41 = vmul.f32 %v2154_v38, %v2154_v38 }
 0xb10   : > { %2158 = vadd.xlane.f32.xlu1 %v2157_v40 }
 0xb11   : > { %v2160_v42 = vsel %vm867_vm2, %v2156_v41, 0.0 }
 0xb12   : > { %2161 = vadd.xlane.f32.xlu0 %v2160_v42 }
 0xb9d   : > { %v2159_v44 = vpop.xlane.xlu1 %2158 }
 0xb9e   : > { %v2163_v46 = vmul.f32 0.03125, %v2159_v44 }
 0xb9f   : > { %v2162_v45 = vpop.xlane.xlu0 %2161 }
 0xba0   : > { %v2165_v47 = vadd.f32 1e-12, %v2163_v46  ;;  %v2164_v48 = vmul.f32 0.03125, %v2162_v45 }
 0xba2   : > { %2901 = vrsqrt.f32 %v2165_v47  ;;  %v2166_v49 = vadd.f32 1e-12, %v2164_v48 }
 0xba4   : > { %2903 = vrsqrt.f32 %v2166_v49 }
 0xbac   : > { %v2902_v50 = vpop.eup %2901 }
 0xbad   : > { %v2169_v52 = vmul.f32 %v2902_v50, %v2153_v36 }
 0xbae   : > { %v2904_v53 = vpop.eup %2903 }
 0xbaf   : > { %v2177_v54 = vmul.f32 %v2576_v51, %v2169_v52  ;;  %v2170_v55 = vmul.f32 %v2904_v53, %v2154_v38 }
 0xbb1   : > { %v2178_v57 = vmul.f32 %v2576_v51, %v2170_v55  ;;  %v2185_v58 = vadd.f32 %v2577_v56, %v2177_v54  ;;  %2192 = sbr.rel (%p2578_p5) target bundleno = 3440 (0xd70), region = 108 }
 0xbb3   : > { %v2186_v59 = vadd.f32 %v2577_v56, %v2178_v57 }
 0xbb5   : > { %v2187_v60 = vpack.c.bf16 %v2186_v59, %v2185_v58  ;;  %v2194_v5 = vrot.slane (!%p2578_p5), %v2186_v59, 7 }
 0xbb7   : > { %2188 = vst.msk [vmem:[#allocation2] sm:$0xff] %vm867_vm2, %v2187_v60  ;;  %v2197_v6 = vsel (!%p2578_p5), %vm2196_vm10, %v2185_v58, %v2194_v5 }
 0xbb8   : > { %2788 = vmatmul.mubr.msk.f32.vlgmr.msra.gmra.mrb[0].mxu0 %vm867_vm2, %v2197_v6 }
 0xc8b   : > { %v2278_v13 = vpop.f32.mrb[0].mxu0 }
 0xc8c   : > { %v2279_v14 = vadd.f32 %v2579_v12, %v2278_v13  ;;  %v2789_v15 = vpop.f32.mrb[1].mxu0 }
 0xc8e   : > { %2905 = vtanh.f32 %v2279_v14 }
 0xc98   : > { %v2906_v16 = vpop.eup %2905 }
 0xc99   : > { %2799 = vmatmul.mubr.msk.f32.vlgmr.msra.gmra.mrb[0].mxu1 %vm867_vm2, %v2906_v16 }
 0xd6c   : > { %v2363_v18 = vpop.f32.mrb[0].mxu1 }
 0xd6d   : > { %v2364_v19 = vadd.f32 %v2581_v17, %v2363_v18  ;;  %v2800_v20 = vpop.f32.mrb[1].mxu1 }
 0xd6f   : > { %2368 = vst.msk [vmem:[#allocation4] sm:$0x3] %vm2367_vm11, %v2364_v19 }
 0xd70 PF: > { %p2817_p6 = scmp.eq.s32.totalorder %s3076_s22, 1  ;;  %s2964_s18 = smov [#allocation4]  }
 0xd71   : > { %s2376_s16 = sshll.u32 %s2964_s18, 4  ;;  %s2377_s16 = int_to_ptr.vmem [resolvable:$true] %s2376_s16 }
 0xd72   : > { %s2907_s6 = scalar_lea.vmem %s2377_s16, 32  ;;  %p2914_p10 = scmp.lt.s32.totalorder %s2377_s16, %s2377_s16 }
 0xd73   : > { %p2908_p7 = scmp.ne.s32.totalorder %s2377_s16, %s2907_s6  ;;  %p2915_p11 = scmp.lt.s32.totalorder %s2907_s6, %s2907_s6 }
 0xd75   : > { %p2909_p8 = pnand %p2908_p7, %p2817_p6  ;;  %p2916_p12 = por %p2915_p11, %p2914_p10 }
 0xd77   : > { %p2910_p9 = pneg %p2909_p8 }
 0xd79   : > { %p2917_p13 = pnand %p2916_p12, %p2910_p9 }
 0xd7b   : > { %2920 = shalt.err (!%p2917_p13)
}
 0xd7c   : > { %s3544_s19 = sld [smem:[#allocation18_spill]] }
 0xd82   : > { %s2921_s2 = scalar_lea.hbm %s3544_s19, 32 }
 0xd83   : > { %p2922_p0 = scmp.ne.s32.totalorder %s3544_s19, %s2921_s2  ;;  %p2927_p3 = scmp.lt.u32.totalorder %s2921_s2, %s3544_s19 }
 0xd85   : > { %p2923_p1 = pnand %p2922_p0, %p2817_p6 }
 0xd87   : > { %p2924_p2 = pneg %p2923_p1 }
 0xd89   : > { %p2929_p4 = pnand %p2927_p3, %p2924_p2 }
 0xd8b   : > { %2932 = shalt.err (!%p2929_p4)
}
 0xd8c   : > { %2814 = dma.vmem_to_hbm [thread:$0]  (%p2817_p6), %s2377_s16, 32, %s3544_s19, [#allocation5]  }
 0xd8d   : > { %2938 = dma.done.wait (%p2817_p6), [#allocation5], 32  }
 0xd8e   : > { %2940 = vsyncadd (%p2817_p6), [#allocation5], 4294967264 }
 0xd8f PF: > { %s3545_s30 = sld [smem:[#allocation7_spill]] }
 0xd95   : > { %s31_s1 = sadd.s32 1, %s3545_s30  }
 0xd96   : > { %p28_p5 = scmp.ge.s32.totalorder %s31_s1, 4  }
 0xd98   :  { %30 = sbr.rel (!%p28_p5) target bundleno = 13 (0xd), region = 168 }
 0xd9f   :  { %2389 = vsyncpa [#allocation5], 1 }
 0xda0   :  { %2391 = vsyncpa [#allocation5 + $0x1], 1 }

</bundles_post_ra>
